<compile_context>
chip_gen: v5e
topology: v5e:2x2
jax: 0.10.0
libtpu: 0.0.40
codegen_flags: <defaults>
</compile_context>

<pallas_src>
import jax
import jax.numpy as jnp
from jax.experimental import pallas as pl
from jax.experimental.pallas import tpu as pltpu

LANE = 128      # vreg lane width
SUBLANE = 8     # vreg sublane count (f32)


def _round_up(x, m):
    return ((x + m - 1) // m) * m


# --------------------------------------------------------------------------- #
# Kernel: fused 4-layer MLP (Linear + ReLU each) on one batch tile.
# --------------------------------------------------------------------------- #
def autoencoder_kernel(x_ref,
                       w1_ref, b1_ref,
                       w2_ref, b2_ref,
                       w3_ref, b3_ref,
                       w4_ref, b4_ref,
                       o_ref):
    cdt = w1_ref.dtype                       # MXU operand dtype (f32 or bf16)
    x = x_ref[...]
    if x.dtype != cdt:                       # bf16 x passes straight through
        x = x.astype(cdt)

    # All matmuls accumulate in f32; bias add + ReLU stay f32.
    h = jnp.dot(x, w1_ref[...], preferred_element_type=jnp.float32) + b1_ref[...]
    h = jnp.maximum(h, 0.0)                  # encoder_hidden

    z = jnp.dot(h.astype(cdt), w2_ref[...], preferred_element_type=jnp.float32) + b2_ref[...]
    z = jnp.maximum(z, 0.0)                  # encoder_output

    d = jnp.dot(z.astype(cdt), w3_ref[...], preferred_element_type=jnp.float32) + b3_ref[...]
    d = jnp.maximum(d, 0.0)                  # decoder_hidden

    y = jnp.dot(d.astype(cdt), w4_ref[...], preferred_element_type=jnp.float32) + b4_ref[...]
    y = jnp.maximum(y, 0.0)                  # decoder_output

    o_ref[...] = y.astype(o_ref.dtype)


# --------------------------------------------------------------------------- #
# Tile derivation with an explicit VMEM budget.
# --------------------------------------------------------------------------- #
def _derive_tile(B, input_size, feat_max, x_bytes, batch_tile,
                 weight_bytes, vmem_limit_bytes):
    """Pick the batch tile (rows per grid step).

    VMEM math per row of tile (all generations):
      2 x (input_size * x_bytes)   double-buffered x input
      2 x (input_size * x_bytes)   double-buffered output
      4 x (feat_max * 4)           ~4 live f32 layer intermediates (h, z, d, y)
    plus 2 x weight_bytes resident and ~4 MiB headroom for Mosaic scratch.
    With the default 64/32/16 sizes a 4096-row tile needs ~13 MiB, well under
    the 48 MiB limit we request (v7x physical VMEM is 64 MiB).
    """
    per_row = (2 * input_size * x_bytes) + (2 * input_size * x_bytes) + 4 * feat_max * 4
    budget = max(per_row * SUBLANE,
                 vmem_limit_bytes - 2 * weight_bytes - (4 << 20))
    max_tile = max(SUBLANE, (budget // per_row) // SUBLANE * SUBLANE)
    tile_cap = max(SUBLANE, min(batch_tile, max_tile) // SUBLANE * SUBLANE)

    if B <= tile_cap:
        # Whole (row-padded-if-ragged) batch in one grid step.
        return _round_up(B, SUBLANE)

    tile = tile_cap
    # Prefer a tile that divides B: avoids the wrapper-side row pad / slice
    # (each is an extra HBM pass over the activation tensor).
    for t in range(tile_cap, max(SUBLANE, tile_cap // 2) - 1, -SUBLANE):
        if B % t == 0:
            tile = t
            break
    return tile


# --------------------------------------------------------------------------- #
# Wrapper
# --------------------------------------------------------------------------- #
def autoencoder_forward(x, params, *,
                        batch_tile=4096,
                        compute_dtype=None,
                        dimension_semantics="auto",
                        small_batch_threshold=0,
                        vmem_limit_bytes=48 * 1024 * 1024):
    """Forward pass of the 4-layer (Linear+ReLU) autoencoder.

    x: (B, input_size), f32 or bf16.  Output dtype matches x.
    params: dict of transposed weights (in, out) and biases (1, out).

    compute_dtype: MXU operand dtype.  None -> bf16 iff x is bf16, else f32
      (f32 is the right default on v5e; pass jnp.bfloat16 on v6e/v7x if the
      producer cannot hand you bf16 activations directly).
    dimension_semantics: "auto" tries pltpu.CORE_PARALLEL (engages both v7x
      TensorCores) and falls back to pltpu.ARBITRARY; pass an explicit tuple
      (recommended when wrapping this in jax.jit, where the probing fallback
      cannot catch late compile errors).
    small_batch_threshold: if B < threshold, use the fused pure-JAX path
      (pallas_call launch overhead dominates tiny batches).  0 disables.
    """
    B, input_size = x.shape
    hidden_size = params["w1"].shape[1]
    bottleneck = params["w2"].shape[1]

    if small_batch_threshold and B < small_batch_threshold:
        return autoencoder_ref(x, params).astype(x.dtype)

    cdt = compute_dtype
    if cdt is None:
        cdt = jnp.bfloat16 if x.dtype == jnp.bfloat16 else jnp.float32

    # ---- weights: zero-pad hidden/bottleneck dims to 128 lanes (exact:
    # padded columns + zero bias stay zero through ReLU). x / output keep the
    # raw input_size as the block's last dim -> no activation pad / slice.
    hid_p = _round_up(hidden_size, LANE)
    bot_p = _round_up(bottleneck, LANE)

    def pad2(a, rows, cols):
        return jnp.pad(a, ((0, rows - a.shape[0]), (0, cols - a.shape[1])))

    w1 = pad2(params["w1"], input_size, hid_p).astype(cdt)     # (in, hid_p)
    b1 = pad2(params["b1"], 1, hid_p).astype(jnp.float32)
    w2 = pad2(params["w2"], hid_p, bot_p).astype(cdt)          # (hid_p, bot_p)
    b2 = pad2(params["b2"], 1, bot_p).astype(jnp.float32)
    w3 = pad2(params["w3"], bot_p, hid_p).astype(cdt)          # (bot_p, hid_p)
    b3 = pad2(params["b3"], 1, hid_p).astype(jnp.float32)
    w4 = pad2(params["w4"], hid_p, input_size).astype(cdt)     # (hid_p, in)
    b4 = params["b4"].astype(jnp.float32)                      # (1, in)
    weights = (w1, b1, w2, b2, w3, b3, w4, b4)
    weight_bytes = sum(int(a.size) * a.dtype.itemsize for a in weights)

    # ---- batch tiling -------------------------------------------------------
    feat_max = max(hid_p, bot_p, _round_up(input_size, LANE))
    tile = _derive_tile(B, input_size, feat_max, x.dtype.itemsize,
                        batch_tile, weight_bytes, vmem_limit_bytes)
    rows_p = _round_up(B, tile)
    grid = (rows_p // tile,)

    # Row pad only when the batch is ragged w.r.t. the tile.
    x_in = x if rows_p == B else jnp.pad(x, ((0, rows_p - B), (0, 0)))

    x_spec = pl.BlockSpec((tile, input_size), lambda i: (i, 0))
    o_spec = pl.BlockSpec((tile, input_size), lambda i: (i, 0))

    def _run(dim_sem, weight_buffering):
        in_specs = [x_spec] + [
            pl.BlockSpec(a.shape, lambda i: (0, 0), pipeline_mode=weight_buffering)
            for a in weights
        ]
        return pl.pallas_call(
            autoencoder_kernel,
            out_shape=jax.ShapeDtypeStruct((rows_p, input_size), x.dtype),
            grid_spec=pltpu.PrefetchScalarGridSpec(
                num_scalar_prefetch=0,
                grid=grid,
                in_specs=in_specs,
                out_specs=o_spec,
            ),
            compiler_params=pltpu.CompilerParams(
                dimension_semantics=dim_sem,
                vmem_limit_bytes=vmem_limit_bytes,
            ),
        )(x_in, *weights)

    if dimension_semantics == "auto":
        # CORE_PARALLEL only pays (and only makes sense) with >1 grid step.
        sem_options = ([(pltpu.CORE_PARALLEL,)] if grid[0] > 1 else []) \
            + [(pltpu.ARBITRARY,)]
    else:
        sem_options = [tuple(dimension_semantics)]
    # Single-buffered resident weights first; plain default buffering as the
    # guaranteed-good fallback (matches the previously-validated structure).
    configs = [(s, b) for s in sem_options for b in (pl.Buffered(1), None)]

    last_err = None
    y_p = None
    for sem, buf in configs:
        try:
            y_p = _run(sem, buf)
            break
        except Exception as e:  # lowering/compile rejection -> next config
            last_err = e
    if y_p is None:
        raise last_err

    return y_p if rows_p == B else y_p[:B]


# --------------------------------------------------------------------------- #
# Params + pure-JAX reference
# --------------------------------------------------------------------------- #
def init_params(key, input_size, hidden_size, output_size):
    """nn.Linear-style U(-1/sqrt(fan_in), 1/sqrt(fan_in)) init.
    Weights stored transposed: (in_features, out_features)."""
    def linear(key, fan_in, fan_out):
        kw, kb = jax.random.split(key)
        bound = 1.0 / jnp.sqrt(fan_in)
        w = jax.random.uniform(kw, (fan_in, fan_out), jnp.float32, -bound, bound)
        b = jax.random.uniform(kb, (1, fan_out), jnp.float32, -bound, bound)
        return w, b

    k1, k2, k3, k4 = jax.random.split(key, 4)
    w1, b1 = linear(k1, input_size, hidden_size)    # encoder_hidden
    w2, b2 = linear(k2, hidden_size, output_size)   # encoder_output
    w3, b3 = linear(k3, output_size, hidden_size)   # decoder_hidden
    w4, b4 = linear(k4, hidden_size, input_size)    # decoder_output
    return dict(w1=w1, b1=b1, w2=w2, b2=b2, w3=w3, b3=b3, w4=w4, b4=b4)


def autoencoder_ref(x, p):
    """Pure-JAX reference matching the PyTorch forward."""
    xf = x.astype(jnp.float32)
    h = jnp.maximum(xf @ p["w1"] + p["b1"], 0.0)
    z = jnp.maximum(h @ p["w2"] + p["b2"], 0.0)
    d = jnp.maximum(z @ p["w3"] + p["b3"], 0.0)
    return jnp.maximum(d @ p["w4"] + p["b4"], 0.0)


# --------------------------------------------------------------------------- #
# Demo / correctness checks
# --------------------------------------------------------------------------- #
if __name__ == "__main__":
    input_size, hidden_size, output_size = 64, 32, 16

    key = jax.random.PRNGKey(0)
    k_params, k_x = jax.random.split(key)
    params = init_params(k_params, input_size, hidden_size, output_size)

    # Case 1: batch that tiles cleanly (B % 8 == 0) -> single grid step,
    # no wrapper-side pad or slice at all.
    B = 256
    x = jax.random.normal(k_x, (B, input_size), jnp.float32)
    out = jax.block_until_ready(autoencoder_forward(x, params))
    ref = autoencoder_ref(x, params)
    assert out.shape == (B, input_size)
    assert jnp.allclose(out, ref, atol=1e-5, rtol=1e-5), "f32 path mismatch"

    # Case 2: ragged batch -> exercises the gated row-pad / row-slice path.
    x2 = x[:50]
    out2 = jax.block_until_ready(autoencoder_forward(x2, params))
    assert out2.shape == (50, input_size)
    assert jnp.allclose(out2, ref[:50], atol=1e-5, rtol=1e-5), "ragged path mismatch"

    # Case 3: bf16 activation stream (v6e/v7x): bf16 x/out halve the HBM
    # traffic; accumulation, bias add and ReLU stay f32 inside the kernel.
    x_bf16 = x.astype(jnp.bfloat16)
    out3 = jax.block_until_ready(autoencoder_forward(x_bf16, params))
    assert out3.dtype == jnp.bfloat16
    assert jnp.allclose(out3.astype(jnp.float32), ref, atol=1e-1, rtol=1e-1), \
        "bf16 path mismatch"

    # Case 4: tiny-batch dispatch to the fused pure-JAX path (kernel skipped).
    out4 = autoencoder_forward(x[:16], params, small_batch_threshold=64)
    assert jnp.allclose(out4, ref[:16], atol=1e-5, rtol=1e-5), "fallback mismatch"

    print("KERNEL_OK")
</pallas_src>

<mosaic_0001>
module attributes {stable_mosaic.version = 11 : i64} {
  func.func @autoencoder_kernel(%arg0: i32, %arg1: memref<256x64xf32, #tpu.memory_space<vmem>>, %arg2: memref<64x128xf32, #tpu.memory_space<vmem>>, %arg3: memref<1x128xf32, #tpu.memory_space<vmem>>, %arg4: memref<128x128xf32, #tpu.memory_space<vmem>>, %arg5: memref<1x128xf32, #tpu.memory_space<vmem>>, %arg6: memref<128x128xf32, #tpu.memory_space<vmem>>, %arg7: memref<1x128xf32, #tpu.memory_space<vmem>>, %arg8: memref<128x64xf32, #tpu.memory_space<vmem>>, %arg9: memref<1x64xf32, #tpu.memory_space<vmem>>, %arg10: memref<256x64xf32, #tpu.memory_space<vmem>>) attributes {dimension_semantics = [#tpu.dimension_semantics<arbitrary>], iteration_bounds = array<i64: 1>, scalar_prefetch = 0 : i64, scratch_operands = 0 : i64, tpu.core_type = #tpu.core_type<tc>, window_params = [{transform_indices = @transform_0, window_bounds = array<i64: 256, 64>}, {pipeline_mode = #tpu.pipeline_mode<synchronous>, transform_indices = @transform_1, window_bounds = array<i64: 64, 128>}, {pipeline_mode = #tpu.pipeline_mode<synchronous>, transform_indices = @transform_2, window_bounds = array<i64: 1, 128>}, {pipeline_mode = #tpu.pipeline_mode<synchronous>, transform_indices = @transform_3, window_bounds = array<i64: 128, 128>}, {pipeline_mode = #tpu.pipeline_mode<synchronous>, transform_indices = @transform_4, window_bounds = array<i64: 1, 128>}, {pipeline_mode = #tpu.pipeline_mode<synchronous>, transform_indices = @transform_5, window_bounds = array<i64: 128, 128>}, {pipeline_mode = #tpu.pipeline_mode<synchronous>, transform_indices = @transform_6, window_bounds = array<i64: 1, 128>}, {pipeline_mode = #tpu.pipeline_mode<synchronous>, transform_indices = @transform_7, window_bounds = array<i64: 128, 64>}, {pipeline_mode = #tpu.pipeline_mode<synchronous>, transform_indices = @transform_8, window_bounds = array<i64: 1, 64>}, {transform_indices = @transform_9, window_bounds = array<i64: 256, 64>}]} {
    %c0 = arith.constant 0 : index
    %c0_0 = arith.constant 0 : index
    %0 = vector.load %arg1[%c0, %c0_0] : memref<256x64xf32, #tpu.memory_space<vmem>>, vector<256x64xf32>
    %c0_1 = arith.constant 0 : index
    %c0_2 = arith.constant 0 : index
    %1 = vector.load %arg2[%c0_1, %c0_2] : memref<64x128xf32, #tpu.memory_space<vmem>>, vector<64x128xf32>
    %cst = arith.constant dense<0.000000e+00> : vector<256x128xf32>
    %2 = tpu.matmul %0, %1, %cst {dimension_numbers = #tpu.dot_dimension_numbers<[1], [0], [0], [1], [0, 0, 1, 1], [], []>} : vector<256x64xf32>, vector<64x128xf32>, vector<256x128xf32> -> vector<256x128xf32>
    %c0_3 = arith.constant 0 : index
    %c0_4 = arith.constant 0 : index
    %3 = vector.load %arg3[%c0_3, %c0_4] : memref<1x128xf32, #tpu.memory_space<vmem>>, vector<1x128xf32>
    %4 = vector.broadcast %3 : vector<1x128xf32> to vector<256x128xf32>
    %5 = arith.addf %2, %4 : vector<256x128xf32>
    %cst_5 = arith.constant 0.000000e+00 : f32
    %6 = vector.broadcast %cst_5 : f32 to vector<256x128xf32>
    %7 = arith.maximumf %5, %6 : vector<256x128xf32>
    %c0_6 = arith.constant 0 : index
    %c0_7 = arith.constant 0 : index
    %8 = vector.load %arg4[%c0_6, %c0_7] : memref<128x128xf32, #tpu.memory_space<vmem>>, vector<128x128xf32>
    %cst_8 = arith.constant dense<0.000000e+00> : vector<256x128xf32>
    %9 = tpu.matmul %7, %8, %cst_8 {dimension_numbers = #tpu.dot_dimension_numbers<[1], [0], [0], [1], [0, 0, 1, 1], [], []>} : vector<256x128xf32>, vector<128x128xf32>, vector<256x128xf32> -> vector<256x128xf32>
    %c0_9 = arith.constant 0 : index
    %c0_10 = arith.constant 0 : index
    %10 = vector.load %arg5[%c0_9, %c0_10] : memref<1x128xf32, #tpu.memory_space<vmem>>, vector<1x128xf32>
    %11 = vector.broadcast %10 : vector<1x128xf32> to vector<256x128xf32>
    %12 = arith.addf %9, %11 : vector<256x128xf32>
    %cst_11 = arith.constant 0.000000e+00 : f32
    %13 = vector.broadcast %cst_11 : f32 to vector<256x128xf32>
    %14 = arith.maximumf %12, %13 : vector<256x128xf32>
    %c0_12 = arith.constant 0 : index
    %c0_13 = arith.constant 0 : index
    %15 = vector.load %arg6[%c0_12, %c0_13] : memref<128x128xf32, #tpu.memory_space<vmem>>, vector<128x128xf32>
    %cst_14 = arith.constant dense<0.000000e+00> : vector<256x128xf32>
    %16 = tpu.matmul %14, %15, %cst_14 {dimension_numbers = #tpu.dot_dimension_numbers<[1], [0], [0], [1], [0, 0, 1, 1], [], []>} : vector<256x128xf32>, vector<128x128xf32>, vector<256x128xf32> -> vector<256x128xf32>
    %c0_15 = arith.constant 0 : index
    %c0_16 = arith.constant 0 : index
    %17 = vector.load %arg7[%c0_15, %c0_16] : memref<1x128xf32, #tpu.memory_space<vmem>>, vector<1x128xf32>
    %18 = vector.broadcast %17 : vector<1x128xf32> to vector<256x128xf32>
    %19 = arith.addf %16, %18 : vector<256x128xf32>
    %cst_17 = arith.constant 0.000000e+00 : f32
    %20 = vector.broadcast %cst_17 : f32 to vector<256x128xf32>
    %21 = arith.maximumf %19, %20 : vector<256x128xf32>
    %c0_18 = arith.constant 0 : index
    %c0_19 = arith.constant 0 : index
    %22 = vector.load %arg8[%c0_18, %c0_19] : memref<128x64xf32, #tpu.memory_space<vmem>>, vector<128x64xf32>
    %cst_20 = arith.constant dense<0.000000e+00> : vector<256x64xf32>
    %23 = tpu.matmul %21, %22, %cst_20 {dimension_numbers = #tpu.dot_dimension_numbers<[1], [0], [0], [1], [0, 0, 1, 1], [], []>} : vector<256x128xf32>, vector<128x64xf32>, vector<256x64xf32> -> vector<256x64xf32>
    %c0_21 = arith.constant 0 : index
    %c0_22 = arith.constant 0 : index
    %24 = vector.load %arg9[%c0_21, %c0_22] : memref<1x64xf32, #tpu.memory_space<vmem>>, vector<1x64xf32>
    %25 = vector.broadcast %24 : vector<1x64xf32> to vector<256x64xf32>
    %26 = arith.addf %23, %25 : vector<256x64xf32>
    %cst_23 = arith.constant 0.000000e+00 : f32
    %27 = vector.broadcast %cst_23 : f32 to vector<256x64xf32>
    %28 = arith.maximumf %26, %27 : vector<256x64xf32>
    %c0_24 = arith.constant 0 : index
    %c0_25 = arith.constant 0 : index
    %29 = vector.load %arg10[%c0_24, %c0_25] : memref<256x64xf32, #tpu.memory_space<vmem>>, vector<256x64xf32>
    tpu.vector_store %arg10[%c0_24, %c0_25], %28 {strides = array<i32>} : memref<256x64xf32, #tpu.memory_space<vmem>>, vector<256x64xf32>,
    return
  }
  func.func @transform_0(%arg0: i32) -> (i32, i32) {
    %c0_i32 = arith.constant 0 : i32
    %c0_i32_0 = arith.constant 0 : i32
    return %arg0, %c0_i32 : i32, i32
  }
  func.func @transform_1(%arg0: i32) -> (i32, i32) {
    %c0_i32 = arith.constant 0 : i32
    %c0_i32_0 = arith.constant 0 : i32
    %c0_i32_1 = arith.constant 0 : i32
    return %c0_i32, %c0_i32_0 : i32, i32
  }
  func.func @transform_2(%arg0: i32) -> (i32, i32) {
    %c0_i32 = arith.constant 0 : i32
    %c0_i32_0 = arith.constant 0 : i32
    %c0_i32_1 = arith.constant 0 : i32
    return %c0_i32, %c0_i32_0 : i32, i32
  }
  func.func @transform_3(%arg0: i32) -> (i32, i32) {
    %c0_i32 = arith.constant 0 : i32
    %c0_i32_0 = arith.constant 0 : i32
    %c0_i32_1 = arith.constant 0 : i32
    return %c0_i32, %c0_i32_0 : i32, i32
  }
  func.func @transform_4(%arg0: i32) -> (i32, i32) {
    %c0_i32 = arith.constant 0 : i32
    %c0_i32_0 = arith.constant 0 : i32
    %c0_i32_1 = arith.constant 0 : i32
    return %c0_i32, %c0_i32_0 : i32, i32
  }
  func.func @transform_5(%arg0: i32) -> (i32, i32) {
    %c0_i32 = arith.constant 0 : i32
    %c0_i32_0 = arith.constant 0 : i32
    %c0_i32_1 = arith.constant 0 : i32
    return %c0_i32, %c0_i32_0 : i32, i32
  }
  func.func @transform_6(%arg0: i32) -> (i32, i32) {
    %c0_i32 = arith.constant 0 : i32
    %c0_i32_0 = arith.constant 0 : i32
    %c0_i32_1 = arith.constant 0 : i32
    return %c0_i32, %c0_i32_0 : i32, i32
  }
  func.func @transform_7(%arg0: i32) -> (i32, i32) {
    %c0_i32 = arith.constant 0 : i32
    %c0_i32_0 = arith.constant 0 : i32
    %c0_i32_1 = arith.constant 0 : i32
    return %c0_i32, %c0_i32_0 : i32, i32
  }
  func.func @transform_8(%arg0: i32) -> (i32, i32) {
    %c0_i32 = arith.constant 0 : i32
    %c0_i32_0 = arith.constant 0 : i32
    %c0_i32_1 = arith.constant 0 : i32
    return %c0_i32, %c0_i32_0 : i32, i32
  }
  func.func @transform_9(%arg0: i32) -> (i32, i32) {
    %c0_i32 = arith.constant 0 : i32
    %c0_i32_0 = arith.constant 0 : i32
    return %arg0, %c0_i32 : i32, i32
  }
}

module attributes {stable_mosaic.version = 11 : i64} {
  func.func @autoencoder_kernel(%arg0: i32, %arg1: memref<256x64xf32, #tpu.memory_space<vmem>>, %arg2: memref<64x128xf32, #tpu.memory_space<vmem>>, %arg3: memref<1x128xf32, #tpu.memory_space<vmem>>, %arg4: memref<128x128xf32, #tpu.memory_space<vmem>>, %arg5: memref<1x128xf32, #tpu.memory_space<vmem>>, %arg6: memref<128x128xf32, #tpu.memory_space<vmem>>, %arg7: memref<1x128xf32, #tpu.memory_space<vmem>>, %arg8: memref<128x64xf32, #tpu.memory_space<vmem>>, %arg9: memref<1x64xf32, #tpu.memory_space<vmem>>, %arg10: memref<256x64xf32, #tpu.memory_space<vmem>>) attributes {dimension_semantics = [#tpu.dimension_semantics<arbitrary>], iteration_bounds = array<i64: 1>, scalar_prefetch = 0 : i64, scratch_operands = 0 : i64, tpu.core_type = #tpu.core_type<tc>, window_params = [{transform_indices = @transform_0, window_bounds = array<i64: 256, 64>}, {pipeline_mode = #tpu.pipeline_mode<synchronous>, transform_indices = @transform_1, window_bounds = array<i64: 64, 128>}, {pipeline_mode = #tpu.pipeline_mode<synchronous>, transform_indices = @transform_2, window_bounds = array<i64: 1, 128>}, {pipeline_mode = #tpu.pipeline_mode<synchronous>, transform_indices = @transform_3, window_bounds = array<i64: 128, 128>}, {pipeline_mode = #tpu.pipeline_mode<synchronous>, transform_indices = @transform_4, window_bounds = array<i64: 1, 128>}, {pipeline_mode = #tpu.pipeline_mode<synchronous>, transform_indices = @transform_5, window_bounds = array<i64: 128, 128>}, {pipeline_mode = #tpu.pipeline_mode<synchronous>, transform_indices = @transform_6, window_bounds = array<i64: 1, 128>}, {pipeline_mode = #tpu.pipeline_mode<synchronous>, transform_indices = @transform_7, window_bounds = array<i64: 128, 64>}, {pipeline_mode = #tpu.pipeline_mode<synchronous>, transform_indices = @transform_8, window_bounds = array<i64: 1, 64>}, {transform_indices = @transform_9, window_bounds = array<i64: 256, 64>}]} {
    %c0 = arith.constant 0 : index
    %c0_0 = arith.constant 0 : index
    %0 = vector.load %arg1[%c0, %c0_0] : memref<256x64xf32, #tpu.memory_space<vmem>>, vector<256x64xf32>
    %c0_1 = arith.constant 0 : index
    %c0_2 = arith.constant 0 : index
    %1 = vector.load %arg2[%c0_1, %c0_2] : memref<64x128xf32, #tpu.memory_space<vmem>>, vector<64x128xf32>
    %cst = arith.constant dense<0.000000e+00> : vector<256x128xf32>
    %2 = tpu.matmul %0, %1, %cst {dimension_numbers = #tpu.dot_dimension_numbers<[1], [0], [0], [1], [0, 0, 1, 1], [], []>} : vector<256x64xf32>, vector<64x128xf32>, vector<256x128xf32> -> vector<256x128xf32>
    %c0_3 = arith.constant 0 : index
    %c0_4 = arith.constant 0 : index
    %3 = vector.load %arg3[%c0_3, %c0_4] : memref<1x128xf32, #tpu.memory_space<vmem>>, vector<1x128xf32>
    %4 = vector.broadcast %3 : vector<1x128xf32> to vector<256x128xf32>
    %5 = arith.addf %2, %4 : vector<256x128xf32>
    %cst_5 = arith.constant 0.000000e+00 : f32
    %6 = vector.broadcast %cst_5 : f32 to vector<256x128xf32>
    %7 = arith.maximumf %5, %6 : vector<256x128xf32>
    %c0_6 = arith.constant 0 : index
    %c0_7 = arith.constant 0 : index
    %8 = vector.load %arg4[%c0_6, %c0_7] : memref<128x128xf32, #tpu.memory_space<vmem>>, vector<128x128xf32>
    %cst_8 = arith.constant dense<0.000000e+00> : vector<256x128xf32>
    %9 = tpu.matmul %7, %8, %cst_8 {dimension_numbers = #tpu.dot_dimension_numbers<[1], [0], [0], [1], [0, 0, 1, 1], [], []>} : vector<256x128xf32>, vector<128x128xf32>, vector<256x128xf32> -> vector<256x128xf32>
    %c0_9 = arith.constant 0 : index
    %c0_10 = arith.constant 0 : index
    %10 = vector.load %arg5[%c0_9, %c0_10] : memref<1x128xf32, #tpu.memory_space<vmem>>, vector<1x128xf32>
    %11 = vector.broadcast %10 : vector<1x128xf32> to vector<256x128xf32>
    %12 = arith.addf %9, %11 : vector<256x128xf32>
    %cst_11 = arith.constant 0.000000e+00 : f32
    %13 = vector.broadcast %cst_11 : f32 to vector<256x128xf32>
    %14 = arith.maximumf %12, %13 : vector<256x128xf32>
    %c0_12 = arith.constant 0 : index
    %c0_13 = arith.constant 0 : index
    %15 = vector.load %arg6[%c0_12, %c0_13] : memref<128x128xf32, #tpu.memory_space<vmem>>, vector<128x128xf32>
    %cst_14 = arith.constant dense<0.000000e+00> : vector<256x128xf32>
    %16 = tpu.matmul %14, %15, %cst_14 {dimension_numbers = #tpu.dot_dimension_numbers<[1], [0], [0], [1], [0, 0, 1, 1], [], []>} : vector<256x128xf32>, vector<128x128xf32>, vector<256x128xf32> -> vector<256x128xf32>
    %c0_15 = arith.constant 0 : index
    %c0_16 = arith.constant 0 : index
    %17 = vector.load %arg7[%c0_15, %c0_16] : memref<1x128xf32, #tpu.memory_space<vmem>>, vector<1x128xf32>
    %18 = vector.broadcast %17 : vector<1x128xf32> to vector<256x128xf32>
    %19 = arith.addf %16, %18 : vector<256x128xf32>
    %cst_17 = arith.constant 0.000000e+00 : f32
    %20 = vector.broadcast %cst_17 : f32 to vector<256x128xf32>
    %21 = arith.maximumf %19, %20 : vector<256x128xf32>
    %c0_18 = arith.constant 0 : index
    %c0_19 = arith.constant 0 : index
    %22 = vector.load %arg8[%c0_18, %c0_19] : memref<128x64xf32, #tpu.memory_space<vmem>>, vector<128x64xf32>
    %cst_20 = arith.constant dense<0.000000e+00> : vector<256x64xf32>
    %23 = tpu.matmul %21, %22, %cst_20 {dimension_numbers = #tpu.dot_dimension_numbers<[1], [0], [0], [1], [0, 0, 1, 1], [], []>} : vector<256x128xf32>, vector<128x64xf32>, vector<256x64xf32> -> vector<256x64xf32>
    %c0_21 = arith.constant 0 : index
    %c0_22 = arith.constant 0 : index
    %24 = vector.load %arg9[%c0_21, %c0_22] : memref<1x64xf32, #tpu.memory_space<vmem>>, vector<1x64xf32>
    %25 = vector.broadcast %24 : vector<1x64xf32> to vector<256x64xf32>
    %26 = arith.addf %23, %25 : vector<256x64xf32>
    %cst_23 = arith.constant 0.000000e+00 : f32
    %27 = vector.broadcast %cst_23 : f32 to vector<256x64xf32>
    %28 = arith.maximumf %26, %27 : vector<256x64xf32>
    %c0_24 = arith.constant 0 : index
    %c0_25 = arith.constant 0 : index
    %29 = vector.load %arg10[%c0_24, %c0_25] : memref<256x64xf32, #tpu.memory_space<vmem>>, vector<256x64xf32>
    tpu.vector_store %arg10[%c0_24, %c0_25], %28 {strides = array<i32>} : memref<256x64xf32, #tpu.memory_space<vmem>>, vector<256x64xf32>,
    return
  }
  func.func @transform_0(%arg0: i32) -> (i32, i32) {
    %c0_i32 = arith.constant 0 : i32
    %c0_i32_0 = arith.constant 0 : i32
    return %arg0, %c0_i32 : i32, i32
  }
  func.func @transform_1(%arg0: i32) -> (i32, i32) {
    %c0_i32 = arith.constant 0 : i32
    %c0_i32_0 = arith.constant 0 : i32
    %c0_i32_1 = arith.constant 0 : i32
    return %c0_i32, %c0_i32_0 : i32, i32
  }
  func.func @transform_2(%arg0: i32) -> (i32, i32) {
    %c0_i32 = arith.constant 0 : i32
    %c0_i32_0 = arith.constant 0 : i32
    %c0_i32_1 = arith.constant 0 : i32
    return %c0_i32, %c0_i32_0 : i32, i32
  }
  func.func @transform_3(%arg0: i32) -> (i32, i32) {
    %c0_i32 = arith.constant 0 : i32
    %c0_i32_0 = arith.constant 0 : i32
    %c0_i32_1 = arith.constant 0 : i32
    return %c0_i32, %c0_i32_0 : i32, i32
  }
  func.func @transform_4(%arg0: i32) -> (i32, i32) {
    %c0_i32 = arith.constant 0 : i32
    %c0_i32_0 = arith.constant 0 : i32
    %c0_i32_1 = arith.constant 0 : i32
    return %c0_i32, %c0_i32_0 : i32, i32
  }
  func.func @transform_5(%arg0: i32) -> (i32, i32) {
    %c0_i32 = arith.constant 0 : i32
    %c0_i32_0 = arith.constant 0 : i32
    %c0_i32_1 = arith.constant 0 : i32
    return %c0_i32, %c0_i32_0 : i32, i32
  }
  func.func @transform_6(%arg0: i32) -> (i32, i32) {
    %c0_i32 = arith.constant 0 : i32
    %c0_i32_0 = arith.constant 0 : i32
    %c0_i32_1 = arith.constant 0 : i32
    return %c0_i32, %c0_i32_0 : i32, i32
  }
  func.func @transform_7(%arg0: i32) -> (i32, i32) {
    %c0_i32 = arith.constant 0 : i32
    %c0_i32_0 = arith.constant 0 : i32
    %c0_i32_1 = arith.constant 0 : i32
    return %c0_i32, %c0_i32_0 : i32, i32
  }
  func.func @transform_8(%arg0: i32) -> (i32, i32) {
    %c0_i32 = arith.constant 0 : i32
    %c0_i32_0 = arith.constant 0 : i32
    %c0_i32_1 = arith.constant 0 : i32
    return %c0_i32, %c0_i32_0 : i32, i32
  }
  func.func @transform_9(%arg0: i32) -> (i32, i32) {
    %c0_i32 = arith.constant 0 : i32
    %c0_i32_0 = arith.constant 0 : i32
    return %arg0, %c0_i32 : i32, i32
  }
}

</mosaic_0001>

<bundles_post_ra>
// kernel: tpu_custom_call.1
= control target key start
LH: loop header
LB: loop body
LE: loop exit
PB: predicated region body
PF: predicated region fallthrough
CT: control target
= control target key end

     0   :  { %vm76_vm0 = vcmask 523264   ;;  %s1507_s1 = inlined_call_operand.vmem [shape: f32[64,128], index: 1, kind: input, shape index: {}]   ;;  %s1508_s2 = inlined_call_operand.vmem [shape: f32[1,128], index: 2, kind: input, shape index: {}]   ;;  %s1509_s0 = inlined_call_operand.vmem [shape: f32[256,64], index: 0, kind: input, shape index: {}]   ;;  %s1510_s3 = inlined_call_operand.vmem [shape: f32[128,128], index: 3, kind: input, shape index: {}]   ;;  %s1511_s4 = inlined_call_operand.vmem [shape: f32[1,128], index: 4, kind: input, shape index: {}]   ;;  %s1512_s5 = inlined_call_operand.vmem [shape: f32[128,128], index: 5, kind: input, shape index: {}]   ;;  %s1513_s6 = inlined_call_operand.vmem [shape: f32[1,128], index: 6, kind: input, shape index: {}]   ;;  %s1514_s7 = inlined_call_operand.vmem [shape: f32[128,64], index: 7, kind: input, shape index: {}]   ;;  %s1515_s8 = inlined_call_operand.vmem [shape: f32[1,64], index: 8, kind: input, shape index: {}]   ;;  %s1516_s9 = inlined_call_operand.vmem [shape: f32[256,64], index: 9, kind: output, shape index: {}]  }
   0x1   :  { %v71_v0 = vld [vmem:[%s1507_s1 + $0x38] sm:$0xff]  ;;  %v70_v1 = vld [vmem:[%s1507_s1 + $0x30] sm:$0xff]  ;;  %v69_v2 = vld [vmem:[%s1507_s1 + $0x28] sm:$0xff] }
   0x2   :  { %181 = vmatpush.msra.mxu0 %v71_v0  ;;  %v68_v3 = vld [vmem:[%s1507_s1 + $0x20] sm:$0xff]  ;;  %v67_v4 = vld [vmem:[%s1507_s1 + $0x18] sm:$0xff]  ;;  %v66_v5 = vld [vmem:[%s1507_s1 + $0x10] sm:$0xff] }
   0x3   :  { %v65_v6 = vld [vmem:[%s1507_s1 + $0x8] sm:$0xff]  ;;  %v64_v7 = vld [vmem:[%s1507_s1] sm:$0xff]  ;;  %v34_v10 = vld [vmem:[%s1509_s0 + $0x10] sm:$0xff] }
   0x4   :  { %182 = vmatpush.msra.mxu0 %v70_v1  ;;  %v32_v8 = vld [vmem:[%s1509_s0] sm:$0xff]  ;;  %v33_v9 = vld [vmem:[%s1509_s0 + $0x8] sm:$0xff]  ;;  %v35_v11 = vld [vmem:[%s1509_s0 + $0x18] sm:$0xff] }
   0x5   :  { %v36_v12 = vld [vmem:[%s1509_s0 + $0x20] sm:$0xff]  ;;  %v37_v13 = vld [vmem:[%s1509_s0 + $0x28] sm:$0xff]  ;;  %v38_v14 = vld [vmem:[%s1509_s0 + $0x30] sm:$0xff] }
   0x6   :  { %183 = vmatpush.msra.mxu0 %v69_v2  ;;  %v39_v15 = vld [vmem:[%s1509_s0 + $0x38] sm:$0xff]  ;;  %v40_v16 = vld [vmem:[%s1509_s0 + $0x40] sm:$0xff]  ;;  %v332_v18 = vld [vmem:[%s1510_s3 + $0x70] sm:$0xff] }
   0x7   :  { %v333_v17 = vld [vmem:[%s1510_s3 + $0x78] sm:$0xff]  ;;  %v331_v19 = vld [vmem:[%s1510_s3 + $0x68] sm:$0xff]  ;;  %v330_v21 = vld [vmem:[%s1510_s3 + $0x60] sm:$0xff] }
   0x8   :  { %184 = vmatpush.msra.mxu0 %v68_v3  ;;  %338 = vmatpush.msra.mxu1 %v333_v17  ;;  %v41_v20 = vld [vmem:[%s1509_s0 + $0x48] sm:$0xff]  ;;  %v329_v22 = vld [vmem:[%s1510_s3 + $0x58] sm:$0xff]  ;;  %v328_v23 = vld [vmem:[%s1510_s3 + $0x50] sm:$0xff] }
   0x9   :  { %v327_v24 = vld [vmem:[%s1510_s3 + $0x48] sm:$0xff]  ;;  %v42_v25 = vld [vmem:[%s1509_s0 + $0x50] sm:$0xff]  ;;  %v326_v26 = vld [vmem:[%s1510_s3 + $0x40] sm:$0xff] }
   0xa   :  { %185 = vmatpush.msra.mxu0 %v67_v4  ;;  %339 = vmatpush.msra.mxu1 %v332_v18  ;;  %v325_v27 = vld [vmem:[%s1510_s3 + $0x38] sm:$0xff]  ;;  %v324_v28 = vld [vmem:[%s1510_s3 + $0x30] sm:$0xff]  ;;  %v323_v29 = vld [vmem:[%s1510_s3 + $0x28] sm:$0xff] }
   0xb   :  { %v43_v30 = vld [vmem:[%s1509_s0 + $0x58] sm:$0xff]  ;;  %v322_v31 = vld [vmem:[%s1510_s3 + $0x20] sm:$0xff]  ;;  %v320_v33 = vld [vmem:[%s1510_s3 + $0x10] sm:$0xff] }
   0xc   :  { %186 = vmatpush.msra.mxu0 %v66_v5  ;;  %340 = vmatpush.msra.mxu1 %v331_v19  ;;  %v321_v32 = vld [vmem:[%s1510_s3 + $0x18] sm:$0xff]  ;;  %v44_v34 = vld [vmem:[%s1509_s0 + $0x60] sm:$0xff]  ;;  %v319_v35 = vld [vmem:[%s1510_s3 + $0x8] sm:$0xff] }
   0xd   :  { %v318_v36 = vld [vmem:[%s1510_s3] sm:$0xff]  ;;  %v45_v37 = vld [vmem:[%s1509_s0 + $0x68] sm:$0xff]  ;;  %v46_v38 = vld [vmem:[%s1509_s0 + $0x70] sm:$0xff] }
   0xe   :  { %187 = vmatpush.msra.mxu0 %v65_v6  ;;  %341 = vmatpush.msra.mxu1 %v330_v21  ;;  %v47_v39 = vld [vmem:[%s1509_s0 + $0x78] sm:$0xff]  ;;  %v1074_v40 = vld [vmem:[%s1508_s2] ss:$0 sm:$0xff]  ;;  %v49_v46 = vld [vmem:[%s1509_s0 + $0x88] sm:$0xff] }
   0xf   :  { %v48_v42 = vld [vmem:[%s1509_s0 + $0x80] sm:$0xff]  ;;  %v50_v50 = vld [vmem:[%s1509_s0 + $0x90] sm:$0xff]  ;;  %v51_v54 = vld [vmem:[%s1509_s0 + $0x98] sm:$0xff] }
  0x10   :  { %188 = vmatpush.msra.mxu0 %v64_v7  ;;  %342 = vmatpush.msra.mxu1 %v329_v22  ;;  %v52_v58 = vld [vmem:[%s1509_s0 + $0xa0] sm:$0xff]  ;;  %v53_v62 = vld [vmem:[%s1509_s0 + $0xa8] sm:$0xff]  ;;  %v54_v2 = vld [vmem:[%s1509_s0 + $0xb0] sm:$0xff] }
  0x11   :  { %849 = vmatmul.msk.f32.vlgmr.msra.gmra.mxu0 %vm76_vm0, %v32_v8  ;;  %v55_v6 = vld [vmem:[%s1509_s0 + $0xb8] sm:$0xff]  ;;  %v497_v17 = vld [vmem:[%s1512_s5 + $0x70] sm:$0xff]  ;;  %v496_v19 = vld [vmem:[%s1512_s5 + $0x68] sm:$0xff] }
  0x12   :  { %343 = vmatpush.msra.mxu1 %v328_v23  ;;  %v494_v21 = vld [vmem:[%s1512_s5 + $0x58] sm:$0xff]  ;;  %v58_v23 = vld [vmem:[%s1509_s0 + $0xd0] sm:$0xff] }
  0x14   :  { %344 = vmatpush.msra.mxu1 %v327_v24 }
  0x16   :  { %345 = vmatpush.msra.mxu1 %v326_v26 }
  0x18   :  { %346 = vmatpush.msra.mxu1 %v325_v27  ;;  %v492_v27 = vld [vmem:[%s1512_s5 + $0x48] sm:$0xff] }
  0x19   :  { %850 = vmatmul.msk.f32.gmra.mxu0 %vm76_vm0, %v33_v9 }
  0x1a   :  { %347 = vmatpush.msra.mxu1 %v324_v28  ;;  %v491_v28 = vld [vmem:[%s1512_s5 + $0x40] sm:$0xff] }
  0x1c   :  { %348 = vmatpush.msra.mxu1 %v323_v29  ;;  %v490_v29 = vld [vmem:[%s1512_s5 + $0x38] sm:$0xff] }
  0x1e   :  { %349 = vmatpush.msra.mxu1 %v322_v31  ;;  %v59_v31 = vld [vmem:[%s1509_s0 + $0xd8] sm:$0xff] }
  0x20   :  { %350 = vmatpush.msra.mxu1 %v321_v32 }
  0x21   :  { %851 = vmatmul.msk.f32.gmra.mxu0 %vm76_vm0, %v34_v10  ;;  %v56_v10 = vld [vmem:[%s1509_s0 + $0xc0] sm:$0xff] }
  0x22   :  { %351 = vmatpush.msra.mxu1 %v320_v33  ;;  %v489_v33 = vld [vmem:[%s1512_s5 + $0x30] sm:$0xff] }
  0x24   :  { %352 = vmatpush.msra.mxu1 %v319_v35  ;;  %v488_v35 = vld [vmem:[%s1512_s5 + $0x28] sm:$0xff] }
  0x26   :  { %353 = vmatpush.msra.mxu1 %v318_v36  ;;  %v487_v36 = vld [vmem:[%s1512_s5 + $0x20] sm:$0xff] }
  0x29   :  { %852 = vmatmul.msk.f32.gmra.mxu0 %vm76_vm0, %v35_v11 }
  0x31   :  { %853 = vmatmul.msk.f32.gmra.mxu0 %vm76_vm0, %v36_v12 }
  0x39   :  { %854 = vmatmul.msk.f32.gmra.mxu0 %vm76_vm0, %v37_v13  ;;  %v498_v13 = vld [vmem:[%s1512_s5 + $0x78] sm:$0xff] }
  0x3a   :  { %503 = vmatpush.msra.mxu2 %v498_v13 }
  0x3c   :  { %504 = vmatpush.msra.mxu2 %v497_v17 }
  0x3e   :  { %505 = vmatpush.msra.mxu2 %v496_v19 }
  0x41   :  { %855 = vmatmul.msk.f32.gmra.mxu0 %vm76_vm0, %v38_v14 }
  0x49   :  { %856 = vmatmul.msk.f32.gmra.mxu0 %vm76_vm0, %v39_v15  ;;  %v57_v15 = vld [vmem:[%s1509_s0 + $0xc8] sm:$0xff] }
  0x51   :  { %857 = vmatmul.msk.f32.gmra.mxu0 %vm76_vm0, %v40_v16 }
  0x59   :  { %858 = vmatmul.msk.f32.gmra.mxu0 %vm76_vm0, %v41_v20  ;;  %v495_v20 = vld [vmem:[%s1512_s5 + $0x60] sm:$0xff] }
  0x5a   :  { %506 = vmatpush.msra.mxu2 %v495_v20 }
  0x5c   :  { %507 = vmatpush.msra.mxu2 %v494_v21 }
  0x61   :  { %859 = vmatmul.msk.f32.gmra.mxu0 %vm76_vm0, %v42_v25  ;;  %v493_v25 = vld [vmem:[%s1512_s5 + $0x50] sm:$0xff] }
  0x62   :  { %508 = vmatpush.msra.mxu2 %v493_v25 }
  0x64   :  { %509 = vmatpush.msra.mxu2 %v492_v27 }
  0x66   :  { %510 = vmatpush.msra.mxu2 %v491_v28 }
  0x68   :  { %511 = vmatpush.msra.mxu2 %v490_v29 }
  0x69   :  { %860 = vmatmul.msk.f32.gmra.mxu0 %vm76_vm0, %v43_v30 }
  0x6a   :  { %512 = vmatpush.msra.mxu2 %v489_v33 }
  0x6c   :  { %513 = vmatpush.msra.mxu2 %v488_v35 }
  0x6e   :  { %514 = vmatpush.msra.mxu2 %v487_v36 }
  0x71   :  { %861 = vmatmul.msk.f32.gmra.mxu0 %vm76_vm0, %v44_v34 }
  0x79   :  { %862 = vmatmul.msk.f32.gmra.mxu0 %vm76_vm0, %v45_v37  ;;  %v486_v37 = vld [vmem:[%s1512_s5 + $0x18] sm:$0xff] }
  0x7a   :  { %515 = vmatpush.msra.mxu2 %v486_v37 }
  0x81   :  { %863 = vmatmul.msk.f32.gmra.mxu0 %vm76_vm0, %v46_v38 }
  0x89   :  { %864 = vmatmul.msk.f32.gmra.mxu0 %vm76_vm0, %v47_v39  ;;  %v60_v39 = vld [vmem:[%s1509_s0 + $0xe0] sm:$0xff] }
  0x8e   :  { %v190_v41 = vpop.f32.mrf.mxu0 }
  0x8f   :  { %v191_v43 = vadd.f32 %v1074_v40, %v190_v41 }
  0x91   :  { %865 = vmatmul.msk.f32.gmra.mxu0 %vm76_vm0, %v48_v42  ;;  %v286_v44 = vmax.f32 %v191_v43, 0.0  ;;  %v485_v42 = vld [vmem:[%s1512_s5 + $0x10] sm:$0xff] }
  0x92   :  { %516 = vmatpush.msra.mxu2 %v485_v42 }
  0x93   :  { %354 = vmatmul.f32.vlgmr.msra.gmra.mxu1 %v286_v44  ;;  %v484_v44 = vld [vmem:[%s1512_s5 + $0x8] sm:$0xff] }
  0x94   :  { %517 = vmatpush.msra.mxu2 %v484_v44 }
  0x96   :  { %v193_v45 = vpop.f32.mrf.mxu0 }
  0x97   :  { %v194_v47 = vadd.f32 %v1074_v40, %v193_v45  ;;  %v483_v45 = vld [vmem:[%s1512_s5] sm:$0xff] }
  0x98   :  { %518 = vmatpush.msra.mxu2 %v483_v45 }
  0x99   :  { %866 = vmatmul.msk.f32.gmra.mxu0 %vm76_vm0, %v49_v46  ;;  %v287_v48 = vmax.f32 %v194_v47, 0.0  ;;  %v61_v47 = vld [vmem:[%s1509_s0 + $0xe8] sm:$0xff] }
  0x9b   :  { %357 = vmatmul.f32.gmra.mxu1 %v287_v48 }
  0x9e   :  { %v196_v49 = vpop.f32.mrf.mxu0 }
  0x9f   :  { %v197_v51 = vadd.f32 %v1074_v40, %v196_v49 }
  0xa1   :  { %867 = vmatmul.msk.f32.gmra.mxu0 %vm76_vm0, %v50_v50  ;;  %v288_v52 = vmax.f32 %v197_v51, 0.0  ;;  %v62_v51 = vld [vmem:[%s1509_s0 + $0xf0] sm:$0xff] }
  0xa3   :  { %360 = vmatmul.f32.gmra.mxu1 %v288_v52 }
  0xa6   :  { %v199_v53 = vpop.f32.mrf.mxu0 }
  0xa7   :  { %v200_v55 = vadd.f32 %v1074_v40, %v199_v53 }
  0xa9   :  { %868 = vmatmul.msk.f32.gmra.mxu0 %vm76_vm0, %v51_v54  ;;  %v289_v56 = vmax.f32 %v200_v55, 0.0  ;;  %v63_v55 = vld [vmem:[%s1509_s0 + $0xf8] sm:$0xff] }
  0xab   :  { %363 = vmatmul.f32.gmra.mxu1 %v289_v56 }
  0xae   :  { %v202_v57 = vpop.f32.mrf.mxu0 }
  0xaf   :  { %v203_v59 = vadd.f32 %v1074_v40, %v202_v57 }
  0xb1   :  { %869 = vmatmul.msk.f32.gmra.mxu0 %vm76_vm0, %v52_v58  ;;  %v290_v60 = vmax.f32 %v203_v59, 0.0  ;;  %v1207_v58 = vld [vmem:[%s1511_s4] ss:$0 sm:$0xff] }
  0xb3   :  { %366 = vmatmul.f32.gmra.mxu1 %v290_v60 }
  0xb6   :  { %v205_v61 = vpop.f32.mrf.mxu0 }
  0xb7   :  { %v206_v63 = vadd.f32 %v1074_v40, %v205_v61 }
  0xb9   :  { %870 = vmatmul.msk.f32.gmra.mxu0 %vm76_vm0, %v53_v62  ;;  %v291_v0 = vmax.f32 %v206_v63, 0.0 }
  0xbb   :  { %369 = vmatmul.f32.gmra.mxu1 %v291_v0 }
  0xbe   :  { %v208_v1 = vpop.f32.mrf.mxu0 }
  0xbf   :  { %v209_v3 = vadd.f32 %v1074_v40, %v208_v1 }
  0xc1   :  { %871 = vmatmul.msk.f32.gmra.mxu0 %vm76_vm0, %v54_v2  ;;  %v292_v4 = vmax.f32 %v209_v3, 0.0 }
  0xc3   :  { %372 = vmatmul.f32.gmra.mxu1 %v292_v4 }
  0xc6   :  { %v211_v5 = vpop.f32.mrf.mxu0 }
  0xc7   :  { %v212_v7 = vadd.f32 %v1074_v40, %v211_v5 }
  0xc9   :  { %872 = vmatmul.msk.f32.gmra.mxu0 %vm76_vm0, %v55_v6  ;;  %v293_v8 = vmax.f32 %v212_v7, 0.0 }
  0xcb   :  { %375 = vmatmul.f32.gmra.mxu1 %v293_v8 }
  0xce   :  { %v214_v9 = vpop.f32.mrf.mxu0 }
  0xcf   :  { %v215_v11 = vadd.f32 %v1074_v40, %v214_v9 }
  0xd1   :  { %v294_v12 = vmax.f32 %v215_v11, 0.0  ;;  %873 = vmatmul.msk.f32.gmra.mxu0 %vm76_vm0, %v56_v10 }
  0xd3   :  { %378 = vmatmul.f32.gmra.mxu1 %v294_v12 }
  0xd6   :  { %v217_v14 = vpop.f32.mrf.mxu0 }
  0xd7   :  { %v218_v16 = vadd.f32 %v1074_v40, %v217_v14 }
  0xd9   :  { %v295_v18 = vmax.f32 %v218_v16, 0.0  ;;  %874 = vmatmul.msk.f32.gmra.mxu0 %vm76_vm0, %v57_v15 }
  0xdb   :  { %381 = vmatmul.f32.gmra.mxu1 %v295_v18 }
  0xde   :  { %v220_v22 = vpop.f32.mrf.mxu0 }
  0xdf   :  { %v221_v24 = vadd.f32 %v1074_v40, %v220_v22 }
  0xe1   :  { %v296_v26 = vmax.f32 %v221_v24, 0.0  ;;  %875 = vmatmul.msk.f32.gmra.mxu0 %vm76_vm0, %v58_v23 }
  0xe3   :  { %384 = vmatmul.f32.gmra.mxu1 %v296_v26 }
  0xe6   :  { %v223_v30 = vpop.f32.mrf.mxu0 }
  0xe7   :  { %v224_v32 = vadd.f32 %v1074_v40, %v223_v30 }
  0xe9   :  { %v297_v34 = vmax.f32 %v224_v32, 0.0  ;;  %876 = vmatmul.msk.f32.gmra.mxu0 %vm76_vm0, %v59_v31 }
  0xeb   :  { %387 = vmatmul.f32.gmra.mxu1 %v297_v34 }
  0xee   :  { %v226_v38 = vpop.f32.mrf.mxu0 }
  0xef   :  { %v227_v41 = vadd.f32 %v1074_v40, %v226_v38 }
  0xf1   :  { %v298_v43 = vmax.f32 %v227_v41, 0.0  ;;  %877 = vmatmul.msk.f32.gmra.mxu0 %vm76_vm0, %v60_v39 }
  0xf3   :  { %390 = vmatmul.f32.gmra.mxu1 %v298_v43 }
  0xf6   :  { %v229_v46 = vpop.f32.mrf.mxu0 }
  0xf7   :  { %v230_v48 = vadd.f32 %v1074_v40, %v229_v46 }
  0xf9   :  { %v299_v49 = vmax.f32 %v230_v48, 0.0  ;;  %878 = vmatmul.msk.f32.gmra.mxu0 %vm76_vm0, %v61_v47 }
  0xfb   :  { %393 = vmatmul.f32.gmra.mxu1 %v299_v49 }
  0xfe   :  { %v232_v50 = vpop.f32.mrf.mxu0 }
  0xff   :  { %v233_v52 = vadd.f32 %v1074_v40, %v232_v50 }
 0x101   :  { %v300_v53 = vmax.f32 %v233_v52, 0.0  ;;  %879 = vmatmul.msk.f32.gmra.mxu0 %vm76_vm0, %v62_v51 }
 0x103   :  { %396 = vmatmul.f32.gmra.mxu1 %v300_v53 }
 0x106   :  { %v235_v54 = vpop.f32.mrf.mxu0 }
 0x107   :  { %v236_v56 = vadd.f32 %v1074_v40, %v235_v54 }
 0x109   :  { %v301_v57 = vmax.f32 %v236_v56, 0.0  ;;  %880 = vmatmul.msk.f32.gmra.mxu0 %vm76_vm0, %v63_v55  ;;  %v663_v56 = vld [vmem:[%s1514_s7 + $0x78] sm:$0xff] }
 0x10a   :  { %668 = vmatpush.msra.mxu3 %v663_v56 }
 0x10b   :  { %399 = vmatmul.f32.gmra.mxu1 %v301_v57 }
 0x10e   :  { %v238_v59 = vpop.f32.mrf.mxu0 }
 0x10f   :  { %v239_v60 = vadd.f32 %v1074_v40, %v238_v59 }
 0x110   :  { %v355_v61 = vpop.f32.mrf.mxu1 }
 0x111   :  { %v302_v62 = vmax.f32 %v239_v60, 0.0  ;;  %v356_v63 = vadd.f32 %v1207_v58, %v355_v61  ;;  %v662_v60 = vld [vmem:[%s1514_s7 + $0x70] sm:$0xff] }
 0x112   :  { %669 = vmatpush.msra.mxu3 %v662_v60 }
 0x113   :  { %402 = vmatmul.f32.gmra.mxu1 %v302_v62  ;;  %v451_v0 = vmax.f32 %v356_v63, 0.0 }
 0x115   :  { %519 = vmatmul.f32.vlgmr.msra.gmra.mxu2 %v451_v0  ;;  %v661_v0 = vld [vmem:[%s1514_s7 + $0x68] sm:$0xff] }
 0x116   :  { %v241_v1 = vpop.f32.mrf.mxu0  ;;  %670 = vmatpush.msra.mxu3 %v661_v0 }
 0x117   :  { %v242_v2 = vadd.f32 %v1074_v40, %v241_v1 }
 0x118   :  { %v358_v3 = vpop.f32.mrf.mxu1 }
 0x119   :  { %v303_v4 = vmax.f32 %v242_v2, 0.0  ;;  %v359_v5 = vadd.f32 %v1207_v58, %v358_v3  ;;  %v660_v2 = vld [vmem:[%s1514_s7 + $0x60] sm:$0xff]  ;;  %v659_v3 = vld [vmem:[%s1514_s7 + $0x58] sm:$0xff] }
 0x11a   :  { %671 = vmatpush.msra.mxu3 %v660_v2 }
 0x11b   :  { %405 = vmatmul.f32.gmra.mxu1 %v303_v4  ;;  %v452_v6 = vmax.f32 %v359_v5, 0.0 }
 0x11c   :  { %672 = vmatpush.msra.mxu3 %v659_v3 }
 0x11d   :  { %522 = vmatmul.f32.gmra.mxu2 %v452_v6  ;;  %v658_v6 = vld [vmem:[%s1514_s7 + $0x50] sm:$0xff] }
 0x11e   :  { %v244_v7 = vpop.f32.mrf.mxu0  ;;  %673 = vmatpush.msra.mxu3 %v658_v6 }
 0x11f   :  { %v245_v8 = vadd.f32 %v1074_v40, %v244_v7 }
 0x120   :  { %v361_v9 = vpop.f32.mrf.mxu1 }
 0x121   :  { %v304_v10 = vmax.f32 %v245_v8, 0.0  ;;  %v362_v11 = vadd.f32 %v1207_v58, %v361_v9 }
 0x123   :  { %408 = vmatmul.f32.gmra.mxu1 %v304_v10  ;;  %v453_v12 = vmax.f32 %v362_v11, 0.0  ;;  %v657_v10 = vld [vmem:[%s1514_s7 + $0x48] sm:$0xff] }
 0x124   :  { %674 = vmatpush.msra.mxu3 %v657_v10 }
 0x125   :  { %525 = vmatmul.f32.gmra.mxu2 %v453_v12  ;;  %v656_v12 = vld [vmem:[%s1514_s7 + $0x40] sm:$0xff] }
 0x126   :  { %v247_v13 = vpop.f32.mrf.mxu0  ;;  %675 = vmatpush.msra.mxu3 %v656_v12 }
 0x127   :  { %v248_v14 = vadd.f32 %v1074_v40, %v247_v13  ;;  %v655_v13 = vld [vmem:[%s1514_s7 + $0x38] sm:$0xff] }
 0x128   :  { %v364_v15 = vpop.f32.mrf.mxu1  ;;  %676 = vmatpush.msra.mxu3 %v655_v13 }
 0x129   :  { %v305_v16 = vmax.f32 %v248_v14, 0.0  ;;  %v365_v17 = vadd.f32 %v1207_v58, %v364_v15 }
 0x12b   :  { %411 = vmatmul.f32.gmra.mxu1 %v305_v16  ;;  %v454_v18 = vmax.f32 %v365_v17, 0.0  ;;  %v654_v16 = vld [vmem:[%s1514_s7 + $0x30] sm:$0xff] }
 0x12c   :  { %677 = vmatpush.msra.mxu3 %v654_v16 }
 0x12d   :  { %528 = vmatmul.f32.gmra.mxu2 %v454_v18 }
 0x12e   :  { %v250_v19 = vpop.f32.mrf.mxu0 }
 0x12f   :  { %v251_v20 = vadd.f32 %v1074_v40, %v250_v19 }
 0x130   :  { %v367_v21 = vpop.f32.mrf.mxu1 }
 0x131   :  { %v306_v22 = vmax.f32 %v251_v20, 0.0  ;;  %v368_v23 = vadd.f32 %v1207_v58, %v367_v21  ;;  %v653_v20 = vld [vmem:[%s1514_s7 + $0x28] sm:$0xff] }
 0x132   :  { %678 = vmatpush.msra.mxu3 %v653_v20 }
 0x133   :  { %414 = vmatmul.f32.gmra.mxu1 %v306_v22  ;;  %v455_v24 = vmax.f32 %v368_v23, 0.0  ;;  %v652_v22 = vld [vmem:[%s1514_s7 + $0x20] sm:$0xff]  ;;  %v651_v23 = vld [vmem:[%s1514_s7 + $0x18] sm:$0xff] }
 0x134   :  { %679 = vmatpush.msra.mxu3 %v652_v22 }
 0x135   :  { %531 = vmatmul.f32.gmra.mxu2 %v455_v24 }
 0x136   :  { %v253_v25 = vpop.f32.mrf.mxu0  ;;  %680 = vmatpush.msra.mxu3 %v651_v23 }
 0x137   :  { %v254_v26 = vadd.f32 %v1074_v40, %v253_v25 }
 0x138   :  { %v370_v27 = vpop.f32.mrf.mxu1 }
 0x139   :  { %v307_v28 = vmax.f32 %v254_v26, 0.0  ;;  %v371_v29 = vadd.f32 %v1207_v58, %v370_v27  ;;  %v650_v26 = vld [vmem:[%s1514_s7 + $0x10] sm:$0xff] }
 0x13a   :  { %681 = vmatpush.msra.mxu3 %v650_v26 }
 0x13b   :  { %417 = vmatmul.f32.gmra.mxu1 %v307_v28  ;;  %v456_v30 = vmax.f32 %v371_v29, 0.0 }
 0x13d   :  { %534 = vmatmul.f32.gmra.mxu2 %v456_v30  ;;  %v649_v30 = vld [vmem:[%s1514_s7 + $0x8] sm:$0xff] }
 0x13e   :  { %v256_v31 = vpop.f32.mrf.mxu0  ;;  %682 = vmatpush.msra.mxu3 %v649_v30 }
 0x13f   :  { %v257_v32 = vadd.f32 %v1074_v40, %v256_v31 }
 0x140   :  { %v373_v33 = vpop.f32.mrf.mxu1 }
 0x141   :  { %v308_v34 = vmax.f32 %v257_v32, 0.0  ;;  %v374_v35 = vadd.f32 %v1207_v58, %v373_v33  ;;  %v648_v32 = vld [vmem:[%s1514_s7] sm:$0xff] }
 0x142   :  { %683 = vmatpush.msra.mxu3 %v648_v32 }
 0x143   :  { %420 = vmatmul.f32.gmra.mxu1 %v308_v34  ;;  %v457_v36 = vmax.f32 %v374_v35, 0.0 }
 0x145   :  { %537 = vmatmul.f32.gmra.mxu2 %v457_v36 }
 0x146   :  { %v259_v37 = vpop.f32.mrf.mxu0 }
 0x147   :  { %v260_v38 = vadd.f32 %v1074_v40, %v259_v37 }
 0x148   :  { %v376_v39 = vpop.f32.mrf.mxu1 }
 0x149   :  { %v309_v41 = vmax.f32 %v260_v38, 0.0  ;;  %v377_v42 = vadd.f32 %v1207_v58, %v376_v39 }
 0x14b   :  { %423 = vmatmul.f32.gmra.mxu1 %v309_v41  ;;  %v458_v43 = vmax.f32 %v377_v42, 0.0 }
 0x14d   :  { %540 = vmatmul.f32.gmra.mxu2 %v458_v43 }
 0x14e   :  { %v262_v44 = vpop.f32.mrf.mxu0 }
 0x14f   :  { %v263_v45 = vadd.f32 %v1074_v40, %v262_v44 }
 0x150   :  { %v379_v46 = vpop.f32.mrf.mxu1 }
 0x151   :  { %v310_v47 = vmax.f32 %v263_v45, 0.0  ;;  %v380_v48 = vadd.f32 %v1207_v58, %v379_v46 }
 0x153   :  { %v459_v49 = vmax.f32 %v380_v48, 0.0  ;;  %426 = vmatmul.f32.gmra.mxu1 %v310_v47 }
 0x155   :  { %543 = vmatmul.f32.gmra.mxu2 %v459_v49  ;;  %v1293_v49 = vld [vmem:[%s1513_s6] ss:$0 sm:$0xff] }
 0x156   :  { %v265_v50 = vpop.f32.mrf.mxu0 }
 0x157   :  { %v266_v51 = vadd.f32 %v1074_v40, %v265_v50 }
 0x158   :  { %v382_v52 = vpop.f32.mrf.mxu1 }
 0x159   :  { %v311_v53 = vmax.f32 %v266_v51, 0.0  ;;  %v383_v54 = vadd.f32 %v1207_v58, %v382_v52 }
 0x15b   :  { %v460_v55 = vmax.f32 %v383_v54, 0.0  ;;  %429 = vmatmul.f32.gmra.mxu1 %v311_v53 }
 0x15d   :  { %546 = vmatmul.f32.gmra.mxu2 %v460_v55 }
 0x15e   :  { %v268_v57 = vpop.f32.mrf.mxu0 }
 0x15f   :  { %v269_v59 = vadd.f32 %v1074_v40, %v268_v57 }
 0x160   :  { %v385_v61 = vpop.f32.mrf.mxu1 }
 0x161   :  { %v312_v62 = vmax.f32 %v269_v59, 0.0  ;;  %v386_v63 = vadd.f32 %v1207_v58, %v385_v61 }
 0x163   :  { %v461_v1 = vmax.f32 %v386_v63, 0.0  ;;  %432 = vmatmul.f32.gmra.mxu1 %v312_v62 }
 0x165   :  { %549 = vmatmul.f32.gmra.mxu2 %v461_v1 }
 0x166   :  { %v271_v4 = vpop.f32.mrf.mxu0 }
 0x167   :  { %v272_v5 = vadd.f32 %v1074_v40, %v271_v4 }
 0x168   :  { %v388_v7 = vpop.f32.mrf.mxu1 }
 0x169   :  { %v313_v8 = vmax.f32 %v272_v5, 0.0  ;;  %v389_v9 = vadd.f32 %v1207_v58, %v388_v7 }
 0x16b   :  { %v462_v11 = vmax.f32 %v389_v9, 0.0  ;;  %435 = vmatmul.f32.gmra.mxu1 %v313_v8 }
 0x16d   :  { %552 = vmatmul.f32.gmra.mxu2 %v462_v11 }
 0x16e   :  { %v274_v14 = vpop.f32.mrf.mxu0 }
 0x16f   :  { %v275_v15 = vadd.f32 %v1074_v40, %v274_v14 }
 0x170   :  { %v391_v17 = vpop.f32.mrf.mxu1 }
 0x171   :  { %v314_v18 = vmax.f32 %v275_v15, 0.0  ;;  %v392_v19 = vadd.f32 %v1207_v58, %v391_v17 }
 0x173   :  { %v463_v21 = vmax.f32 %v392_v19, 0.0  ;;  %438 = vmatmul.f32.gmra.mxu1 %v314_v18 }
 0x175   :  { %555 = vmatmul.f32.gmra.mxu2 %v463_v21 }
 0x176   :  { %v277_v24 = vpop.f32.mrf.mxu0 }
 0x177   :  { %v278_v25 = vadd.f32 %v1074_v40, %v277_v24 }
 0x178   :  { %v394_v27 = vpop.f32.mrf.mxu1 }
 0x179   :  { %v315_v28 = vmax.f32 %v278_v25, 0.0  ;;  %v395_v29 = vadd.f32 %v1207_v58, %v394_v27 }
 0x17b   :  { %v464_v31 = vmax.f32 %v395_v29, 0.0  ;;  %441 = vmatmul.f32.gmra.mxu1 %v315_v28 }
 0x17d   :  { %558 = vmatmul.f32.gmra.mxu2 %v464_v31 }
 0x17e   :  { %v280_v33 = vpop.f32.mrf.mxu0 }
 0x17f   :  { %v281_v34 = vadd.f32 %v1074_v40, %v280_v33 }
 0x180   :  { %v397_v35 = vpop.f32.mrf.mxu1 }
 0x181   :  { %v316_v36 = vmax.f32 %v281_v34, 0.0  ;;  %v398_v37 = vadd.f32 %v1207_v58, %v397_v35 }
 0x183   :  { %v465_v38 = vmax.f32 %v398_v37, 0.0  ;;  %444 = vmatmul.f32.gmra.mxu1 %v316_v36 }
 0x185   :  { %561 = vmatmul.f32.gmra.mxu2 %v465_v38 }
 0x186   :  { %v283_v39 = vpop.f32.mrf.mxu0 }
 0x187   :  { %v284_v41 = vadd.f32 %v1074_v40, %v283_v39 }
 0x188   :  { %v400_v42 = vpop.f32.mrf.mxu1 }
 0x189   :  { %v317_v43 = vmax.f32 %v284_v41, 0.0  ;;  %v401_v44 = vadd.f32 %v1207_v58, %v400_v42 }
 0x18b   :  { %v466_v45 = vmax.f32 %v401_v44, 0.0  ;;  %447 = vmatmul.f32.gmra.mxu1 %v317_v43 }
 0x18d   :  { %564 = vmatmul.f32.gmra.mxu2 %v466_v45 }
 0x190   :  { %v403_v46 = vpop.f32.mrf.mxu1 }
 0x191   :  { %v404_v47 = vadd.f32 %v1207_v58, %v403_v46 }
 0x193   :  { %v467_v48 = vmax.f32 %v404_v47, 0.0 }
 0x195   :  { %567 = vmatmul.f32.gmra.mxu2 %v467_v48 }
 0x198   :  { %v406_v50 = vpop.f32.mrf.mxu1  ;;  %v520_v51 = vpop.f32.mrf.mxu2 }
 0x199   :  { %v407_v40 = vadd.f32 %v1207_v58, %v406_v50  ;;  %v521_v52 = vadd.f32 %v1293_v49, %v520_v51 }
 0x19b   :  { %v468_v53 = vmax.f32 %v407_v40, 0.0  ;;  %v616_v54 = vmax.f32 %v521_v52, 0.0 }
 0x19d   :  { %570 = vmatmul.f32.gmra.mxu2 %v468_v53  ;;  %684 = vmatmul.f32.vlgmr.msra.gmra.mxu3 %v616_v54 }
 0x1a0   :  { %v409_v55 = vpop.f32.mrf.mxu1  ;;  %v523_v56 = vpop.f32.mrf.mxu2 }
 0x1a1   :  { %v410_v57 = vadd.f32 %v1207_v58, %v409_v55  ;;  %v524_v59 = vadd.f32 %v1293_v49, %v523_v56 }
 0x1a3   :  { %v469_v60 = vmax.f32 %v410_v57, 0.0  ;;  %v617_v61 = vmax.f32 %v524_v59, 0.0 }
 0x1a5   :  { %573 = vmatmul.f32.gmra.mxu2 %v469_v60  ;;  %687 = vmatmul.f32.gmra.mxu3 %v617_v61 }
 0x1a8   :  { %v412_v62 = vpop.f32.mrf.mxu1  ;;  %v526_v63 = vpop.f32.mrf.mxu2 }
 0x1a9   :  { %v413_v0 = vadd.f32 %v1207_v58, %v412_v62  ;;  %v527_v1 = vadd.f32 %v1293_v49, %v526_v63 }
 0x1ab   :  { %v470_v2 = vmax.f32 %v413_v0, 0.0  ;;  %v618_v3 = vmax.f32 %v527_v1, 0.0 }
 0x1ad   :  { %576 = vmatmul.f32.gmra.mxu2 %v470_v2  ;;  %690 = vmatmul.f32.gmra.mxu3 %v618_v3 }
 0x1b0   :  { %v415_v4 = vpop.f32.mrf.mxu1  ;;  %v529_v5 = vpop.f32.mrf.mxu2 }
 0x1b1   :  { %v416_v6 = vadd.f32 %v1207_v58, %v415_v4  ;;  %v530_v7 = vadd.f32 %v1293_v49, %v529_v5 }
 0x1b3   :  { %v471_v8 = vmax.f32 %v416_v6, 0.0  ;;  %v619_v9 = vmax.f32 %v530_v7, 0.0 }
 0x1b5   :  { %579 = vmatmul.f32.gmra.mxu2 %v471_v8  ;;  %693 = vmatmul.f32.gmra.mxu3 %v619_v9 }
 0x1b8   :  { %v418_v10 = vpop.f32.mrf.mxu1  ;;  %v532_v11 = vpop.f32.mrf.mxu2 }
 0x1b9   :  { %v419_v12 = vadd.f32 %v1207_v58, %v418_v10  ;;  %v533_v13 = vadd.f32 %v1293_v49, %v532_v11 }
 0x1bb   :  { %v472_v14 = vmax.f32 %v419_v12, 0.0  ;;  %v620_v15 = vmax.f32 %v533_v13, 0.0 }
 0x1bd   :  { %582 = vmatmul.f32.gmra.mxu2 %v472_v14  ;;  %696 = vmatmul.f32.gmra.mxu3 %v620_v15 }
 0x1c0   :  { %v421_v16 = vpop.f32.mrf.mxu1  ;;  %v535_v17 = vpop.f32.mrf.mxu2 }
 0x1c1   :  { %v422_v18 = vadd.f32 %v1207_v58, %v421_v16  ;;  %v536_v19 = vadd.f32 %v1293_v49, %v535_v17 }
 0x1c3   :  { %v473_v20 = vmax.f32 %v422_v18, 0.0  ;;  %v621_v21 = vmax.f32 %v536_v19, 0.0 }
 0x1c5   :  { %585 = vmatmul.f32.gmra.mxu2 %v473_v20  ;;  %699 = vmatmul.f32.gmra.mxu3 %v621_v21 }
 0x1c8   :  { %v424_v22 = vpop.f32.mrf.mxu1  ;;  %v538_v23 = vpop.f32.mrf.mxu2 }
 0x1c9   :  { %v425_v24 = vadd.f32 %v1207_v58, %v424_v22  ;;  %v539_v25 = vadd.f32 %v1293_v49, %v538_v23 }
 0x1cb   :  { %v474_v26 = vmax.f32 %v425_v24, 0.0  ;;  %v622_v27 = vmax.f32 %v539_v25, 0.0 }
 0x1cd   :  { %588 = vmatmul.f32.gmra.mxu2 %v474_v26  ;;  %702 = vmatmul.f32.gmra.mxu3 %v622_v27 }
 0x1d0   :  { %v427_v28 = vpop.f32.mrf.mxu1  ;;  %v541_v29 = vpop.f32.mrf.mxu2 }
 0x1d1   :  { %v428_v30 = vadd.f32 %v1207_v58, %v427_v28  ;;  %v542_v31 = vadd.f32 %v1293_v49, %v541_v29 }
 0x1d3   :  { %v475_v32 = vmax.f32 %v428_v30, 0.0  ;;  %v623_v33 = vmax.f32 %v542_v31, 0.0 }
 0x1d5   :  { %591 = vmatmul.f32.gmra.mxu2 %v475_v32  ;;  %705 = vmatmul.f32.gmra.mxu3 %v623_v33 }
 0x1d8   :  { %v430_v34 = vpop.f32.mrf.mxu1  ;;  %v544_v35 = vpop.f32.mrf.mxu2 }
 0x1d9   :  { %v431_v36 = vadd.f32 %v1207_v58, %v430_v34  ;;  %v545_v37 = vadd.f32 %v1293_v49, %v544_v35 }
 0x1db   :  { %v476_v38 = vmax.f32 %v431_v36, 0.0  ;;  %v624_v39 = vmax.f32 %v545_v37, 0.0 }
 0x1dd   :  { %594 = vmatmul.f32.gmra.mxu2 %v476_v38  ;;  %708 = vmatmul.f32.gmra.mxu3 %v624_v39 }
 0x1e0   :  { %v433_v41 = vpop.f32.mrf.mxu1  ;;  %v547_v42 = vpop.f32.mrf.mxu2 }
 0x1e1   :  { %v434_v43 = vadd.f32 %v1207_v58, %v433_v41  ;;  %v548_v44 = vadd.f32 %v1293_v49, %v547_v42 }
 0x1e3   :  { %v477_v45 = vmax.f32 %v434_v43, 0.0  ;;  %v625_v46 = vmax.f32 %v548_v44, 0.0 }
 0x1e5   :  { %597 = vmatmul.f32.gmra.mxu2 %v477_v45  ;;  %711 = vmatmul.f32.gmra.mxu3 %v625_v46 }
 0x1e8   :  { %v436_v47 = vpop.f32.mrf.mxu1  ;;  %v550_v48 = vpop.f32.mrf.mxu2 }
 0x1e9   :  { %v437_v50 = vadd.f32 %v1207_v58, %v436_v47  ;;  %v551_v51 = vadd.f32 %v1293_v49, %v550_v48 }
 0x1eb   :  { %v478_v40 = vmax.f32 %v437_v50, 0.0  ;;  %v626_v52 = vmax.f32 %v551_v51, 0.0 }
 0x1ed   :  { %600 = vmatmul.f32.gmra.mxu2 %v478_v40  ;;  %714 = vmatmul.f32.gmra.mxu3 %v626_v52 }
 0x1f0   :  { %v439_v53 = vpop.f32.mrf.mxu1  ;;  %v553_v54 = vpop.f32.mrf.mxu2 }
 0x1f1   :  { %v440_v55 = vadd.f32 %v1207_v58, %v439_v53  ;;  %v554_v56 = vadd.f32 %v1293_v49, %v553_v54 }
 0x1f3   :  { %v479_v57 = vmax.f32 %v440_v55, 0.0  ;;  %v627_v59 = vmax.f32 %v554_v56, 0.0 }
 0x1f5   :  { %603 = vmatmul.f32.gmra.mxu2 %v479_v57  ;;  %717 = vmatmul.f32.gmra.mxu3 %v627_v59 }
 0x1f8   :  { %v442_v60 = vpop.f32.mrf.mxu1  ;;  %v556_v61 = vpop.f32.mrf.mxu2 }
 0x1f9   :  { %v443_v62 = vadd.f32 %v1207_v58, %v442_v60  ;;  %v557_v63 = vadd.f32 %v1293_v49, %v556_v61 }
 0x1fb   :  { %v480_v0 = vmax.f32 %v443_v62, 0.0  ;;  %v628_v1 = vmax.f32 %v557_v63, 0.0 }
 0x1fd   :  { %606 = vmatmul.f32.gmra.mxu2 %v480_v0  ;;  %720 = vmatmul.f32.gmra.mxu3 %v628_v1 }
 0x200   :  { %v445_v2 = vpop.f32.mrf.mxu1  ;;  %v559_v3 = vpop.f32.mrf.mxu2 }
 0x201   :  { %v446_v4 = vadd.f32 %v1207_v58, %v445_v2  ;;  %v560_v5 = vadd.f32 %v1293_v49, %v559_v3 }
 0x203   :  { %v481_v6 = vmax.f32 %v446_v4, 0.0  ;;  %v629_v7 = vmax.f32 %v560_v5, 0.0 }
 0x205   :  { %609 = vmatmul.f32.gmra.mxu2 %v481_v6  ;;  %723 = vmatmul.f32.gmra.mxu3 %v629_v7 }
 0x208   :  { %v448_v8 = vpop.f32.mrf.mxu1  ;;  %v562_v9 = vpop.f32.mrf.mxu2 }
 0x209   :  { %v449_v10 = vadd.f32 %v1207_v58, %v448_v8  ;;  %v563_v11 = vadd.f32 %v1293_v49, %v562_v9  ;;  %v1330_v58 = vld [vmem:[%s1515_s8] ss:$0 sm:$0xff] }
 0x20b   :  { %v482_v12 = vmax.f32 %v449_v10, 0.0  ;;  %v630_v13 = vmax.f32 %v563_v11, 0.0 }
 0x20d   :  { %612 = vmatmul.f32.gmra.mxu2 %v482_v12  ;;  %726 = vmatmul.f32.gmra.mxu3 %v630_v13 }
 0x210   :  { %v565_v14 = vpop.f32.mrf.mxu2 }
 0x211   :  { %v566_v15 = vadd.f32 %v1293_v49, %v565_v14 }
 0x213   :  { %v631_v16 = vmax.f32 %v566_v15, 0.0 }
 0x215   :  { %729 = vmatmul.f32.gmra.mxu3 %v631_v16 }
 0x218   :  { %v568_v17 = vpop.f32.mrf.mxu2 }
 0x219   :  { %v569_v18 = vadd.f32 %v1293_v49, %v568_v17 }
 0x21b   :  { %v632_v19 = vmax.f32 %v569_v18, 0.0 }
 0x21d   :  { %732 = vmatmul.f32.gmra.mxu3 %v632_v19 }
 0x220   :  { %v571_v20 = vpop.f32.mrf.mxu2  ;;  %v685_v21 = vpop.f32.mrf.mxu3 }
 0x221   :  { %v572_v22 = vadd.f32 %v1293_v49, %v571_v20  ;;  %v686_v23 = vadd.f32 %v1330_v58, %v685_v21 }
 0x223   :  { %v633_v24 = vmax.f32 %v572_v22, 0.0  ;;  %v781_v25 = vmax.f32 %v686_v23, 0.0 }
 0x225   :  { %813 = vst.msk [vmem:[%s1516_s9] sm:$0xff] %vm76_vm0, %v781_v25  ;;  %735 = vmatmul.f32.gmra.mxu3 %v633_v24 }
 0x228   :  { %v574_v26 = vpop.f32.mrf.mxu2  ;;  %v688_v27 = vpop.f32.mrf.mxu3 }
 0x229   :  { %v575_v28 = vadd.f32 %v1293_v49, %v574_v26  ;;  %v689_v29 = vadd.f32 %v1330_v58, %v688_v27 }
 0x22b   :  { %v634_v30 = vmax.f32 %v575_v28, 0.0  ;;  %v782_v31 = vmax.f32 %v689_v29, 0.0 }
 0x22d   :  { %814 = vst.msk [vmem:[%s1516_s9 + $0x8] sm:$0xff] %vm76_vm0, %v782_v31  ;;  %738 = vmatmul.f32.gmra.mxu3 %v634_v30 }
 0x230   :  { %v577_v32 = vpop.f32.mrf.mxu2  ;;  %v691_v33 = vpop.f32.mrf.mxu3 }
 0x231   :  { %v578_v34 = vadd.f32 %v1293_v49, %v577_v32  ;;  %v692_v35 = vadd.f32 %v1330_v58, %v691_v33 }
 0x233   :  { %v635_v36 = vmax.f32 %v578_v34, 0.0  ;;  %v783_v37 = vmax.f32 %v692_v35, 0.0 }
 0x235   :  { %815 = vst.msk [vmem:[%s1516_s9 + $0x10] sm:$0xff] %vm76_vm0, %v783_v37  ;;  %741 = vmatmul.f32.gmra.mxu3 %v635_v36 }
 0x238   :  { %v580_v38 = vpop.f32.mrf.mxu2  ;;  %v694_v39 = vpop.f32.mrf.mxu3 }
 0x239   :  { %v581_v41 = vadd.f32 %v1293_v49, %v580_v38  ;;  %v695_v42 = vadd.f32 %v1330_v58, %v694_v39 }
 0x23b   :  { %v636_v43 = vmax.f32 %v581_v41, 0.0  ;;  %v784_v44 = vmax.f32 %v695_v42, 0.0 }
 0x23d   :  { %816 = vst.msk [vmem:[%s1516_s9 + $0x18] sm:$0xff] %vm76_vm0, %v784_v44  ;;  %744 = vmatmul.f32.gmra.mxu3 %v636_v43 }
 0x240   :  { %v583_v45 = vpop.f32.mrf.mxu2  ;;  %v697_v46 = vpop.f32.mrf.mxu3 }
 0x241   :  { %v584_v47 = vadd.f32 %v1293_v49, %v583_v45  ;;  %v698_v48 = vadd.f32 %v1330_v58, %v697_v46 }
 0x243   :  { %v637_v50 = vmax.f32 %v584_v47, 0.0  ;;  %v785_v51 = vmax.f32 %v698_v48, 0.0 }
 0x245   :  { %817 = vst.msk [vmem:[%s1516_s9 + $0x20] sm:$0xff] %vm76_vm0, %v785_v51  ;;  %747 = vmatmul.f32.gmra.mxu3 %v637_v50 }
 0x248   :  { %v586_v40 = vpop.f32.mrf.mxu2  ;;  %v700_v52 = vpop.f32.mrf.mxu3 }
 0x249   :  { %v587_v53 = vadd.f32 %v1293_v49, %v586_v40  ;;  %v701_v54 = vadd.f32 %v1330_v58, %v700_v52 }
 0x24b   :  { %v638_v55 = vmax.f32 %v587_v53, 0.0  ;;  %v786_v56 = vmax.f32 %v701_v54, 0.0 }
 0x24d   :  { %818 = vst.msk [vmem:[%s1516_s9 + $0x28] sm:$0xff] %vm76_vm0, %v786_v56  ;;  %750 = vmatmul.f32.gmra.mxu3 %v638_v55 }
 0x250   :  { %v589_v57 = vpop.f32.mrf.mxu2  ;;  %v703_v59 = vpop.f32.mrf.mxu3 }
 0x251   :  { %v590_v60 = vadd.f32 %v1293_v49, %v589_v57  ;;  %v704_v61 = vadd.f32 %v1330_v58, %v703_v59 }
 0x253   :  { %v639_v62 = vmax.f32 %v590_v60, 0.0  ;;  %v787_v63 = vmax.f32 %v704_v61, 0.0 }
 0x255   :  { %819 = vst.msk [vmem:[%s1516_s9 + $0x30] sm:$0xff] %vm76_vm0, %v787_v63  ;;  %753 = vmatmul.f32.gmra.mxu3 %v639_v62 }
 0x258   :  { %v592_v0 = vpop.f32.mrf.mxu2  ;;  %v706_v1 = vpop.f32.mrf.mxu3 }
 0x259   :  { %v593_v2 = vadd.f32 %v1293_v49, %v592_v0  ;;  %v707_v3 = vadd.f32 %v1330_v58, %v706_v1 }
 0x25b   :  { %v640_v4 = vmax.f32 %v593_v2, 0.0  ;;  %v788_v5 = vmax.f32 %v707_v3, 0.0 }
 0x25d   :  { %820 = vst.msk [vmem:[%s1516_s9 + $0x38] sm:$0xff] %vm76_vm0, %v788_v5  ;;  %756 = vmatmul.f32.gmra.mxu3 %v640_v4 }
 0x260   :  { %v595_v6 = vpop.f32.mrf.mxu2  ;;  %v709_v7 = vpop.f32.mrf.mxu3 }
 0x261   :  { %v596_v8 = vadd.f32 %v1293_v49, %v595_v6  ;;  %v710_v9 = vadd.f32 %v1330_v58, %v709_v7 }
 0x263   :  { %v641_v10 = vmax.f32 %v596_v8, 0.0  ;;  %v789_v11 = vmax.f32 %v710_v9, 0.0 }
 0x265   :  { %821 = vst.msk [vmem:[%s1516_s9 + $0x40] sm:$0xff] %vm76_vm0, %v789_v11  ;;  %759 = vmatmul.f32.gmra.mxu3 %v641_v10 }
 0x268   :  { %v598_v12 = vpop.f32.mrf.mxu2  ;;  %v712_v13 = vpop.f32.mrf.mxu3 }
 0x269   :  { %v599_v14 = vadd.f32 %v1293_v49, %v598_v12  ;;  %v713_v15 = vadd.f32 %v1330_v58, %v712_v13 }
 0x26b   :  { %v642_v16 = vmax.f32 %v599_v14, 0.0  ;;  %v790_v17 = vmax.f32 %v713_v15, 0.0 }
 0x26d   :  { %822 = vst.msk [vmem:[%s1516_s9 + $0x48] sm:$0xff] %vm76_vm0, %v790_v17  ;;  %762 = vmatmul.f32.gmra.mxu3 %v642_v16 }
 0x270   :  { %v601_v18 = vpop.f32.mrf.mxu2  ;;  %v715_v19 = vpop.f32.mrf.mxu3 }
 0x271   :  { %v602_v20 = vadd.f32 %v1293_v49, %v601_v18  ;;  %v716_v21 = vadd.f32 %v1330_v58, %v715_v19 }
 0x273   :  { %v643_v22 = vmax.f32 %v602_v20, 0.0  ;;  %v791_v23 = vmax.f32 %v716_v21, 0.0 }
 0x275   :  { %823 = vst.msk [vmem:[%s1516_s9 + $0x50] sm:$0xff] %vm76_vm0, %v791_v23  ;;  %765 = vmatmul.f32.gmra.mxu3 %v643_v22 }
 0x278   :  { %v604_v24 = vpop.f32.mrf.mxu2  ;;  %v718_v25 = vpop.f32.mrf.mxu3 }
 0x279   :  { %v605_v26 = vadd.f32 %v1293_v49, %v604_v24  ;;  %v719_v27 = vadd.f32 %v1330_v58, %v718_v25 }
 0x27b   :  { %v644_v28 = vmax.f32 %v605_v26, 0.0  ;;  %v792_v29 = vmax.f32 %v719_v27, 0.0 }
 0x27d   :  { %824 = vst.msk [vmem:[%s1516_s9 + $0x58] sm:$0xff] %vm76_vm0, %v792_v29  ;;  %768 = vmatmul.f32.gmra.mxu3 %v644_v28 }
 0x280   :  { %v607_v30 = vpop.f32.mrf.mxu2  ;;  %v721_v31 = vpop.f32.mrf.mxu3 }
 0x281   :  { %v608_v32 = vadd.f32 %v1293_v49, %v607_v30  ;;  %v722_v33 = vadd.f32 %v1330_v58, %v721_v31 }
 0x283   :  { %v645_v34 = vmax.f32 %v608_v32, 0.0  ;;  %v793_v35 = vmax.f32 %v722_v33, 0.0 }
 0x285   :  { %825 = vst.msk [vmem:[%s1516_s9 + $0x60] sm:$0xff] %vm76_vm0, %v793_v35  ;;  %771 = vmatmul.f32.gmra.mxu3 %v645_v34 }
 0x288   :  { %v610_v36 = vpop.f32.mrf.mxu2  ;;  %v724_v37 = vpop.f32.mrf.mxu3 }
 0x289   :  { %v611_v38 = vadd.f32 %v1293_v49, %v610_v36  ;;  %v725_v39 = vadd.f32 %v1330_v58, %v724_v37 }
 0x28b   :  { %v646_v41 = vmax.f32 %v611_v38, 0.0  ;;  %v794_v42 = vmax.f32 %v725_v39, 0.0 }
 0x28d   :  { %826 = vst.msk [vmem:[%s1516_s9 + $0x68] sm:$0xff] %vm76_vm0, %v794_v42  ;;  %774 = vmatmul.f32.gmra.mxu3 %v646_v41 }
 0x290   :  { %v613_v43 = vpop.f32.mrf.mxu2  ;;  %v727_v44 = vpop.f32.mrf.mxu3 }
 0x291   :  { %v614_v45 = vadd.f32 %v1293_v49, %v613_v43  ;;  %v728_v46 = vadd.f32 %v1330_v58, %v727_v44 }
 0x293   :  { %v647_v47 = vmax.f32 %v614_v45, 0.0  ;;  %v795_v48 = vmax.f32 %v728_v46, 0.0 }
 0x295   :  { %827 = vst.msk [vmem:[%s1516_s9 + $0x70] sm:$0xff] %vm76_vm0, %v795_v48  ;;  %777 = vmatmul.f32.gmra.mxu3 %v647_v47 }
 0x298   :  { %v730_v50 = vpop.f32.mrf.mxu3 }
 0x299   :  { %v731_v51 = vadd.f32 %v1330_v58, %v730_v50 }
 0x29b   :  { %v796_v40 = vmax.f32 %v731_v51, 0.0 }
 0x29d   :  { %828 = vst.msk [vmem:[%s1516_s9 + $0x78] sm:$0xff] %vm76_vm0, %v796_v40 }
 0x2a0   :  { %v733_v49 = vpop.f32.mrf.mxu3 }
 0x2a1   :  { %v734_v52 = vadd.f32 %v1330_v58, %v733_v49 }
 0x2a3   :  { %v797_v53 = vmax.f32 %v734_v52, 0.0 }
 0x2a5   :  { %829 = vst.msk [vmem:[%s1516_s9 + $0x80] sm:$0xff] %vm76_vm0, %v797_v53 }
 0x2a8   :  { %v736_v54 = vpop.f32.mrf.mxu3 }
 0x2a9   :  { %v737_v55 = vadd.f32 %v1330_v58, %v736_v54 }
 0x2ab   :  { %v798_v56 = vmax.f32 %v737_v55, 0.0 }
 0x2ad   :  { %830 = vst.msk [vmem:[%s1516_s9 + $0x88] sm:$0xff] %vm76_vm0, %v798_v56 }
 0x2b0   :  { %v739_v57 = vpop.f32.mrf.mxu3 }
 0x2b1   :  { %v740_v59 = vadd.f32 %v1330_v58, %v739_v57 }
 0x2b3   :  { %v799_v60 = vmax.f32 %v740_v59, 0.0 }
 0x2b5   :  { %831 = vst.msk [vmem:[%s1516_s9 + $0x90] sm:$0xff] %vm76_vm0, %v799_v60 }
 0x2b8   :  { %v742_v61 = vpop.f32.mrf.mxu3 }
 0x2b9   :  { %v743_v62 = vadd.f32 %v1330_v58, %v742_v61 }
 0x2bb   :  { %v800_v63 = vmax.f32 %v743_v62, 0.0 }
 0x2bd   :  { %832 = vst.msk [vmem:[%s1516_s9 + $0x98] sm:$0xff] %vm76_vm0, %v800_v63 }
 0x2c0   :  { %v745_v0 = vpop.f32.mrf.mxu3 }
 0x2c1   :  { %v746_v1 = vadd.f32 %v1330_v58, %v745_v0 }
 0x2c3   :  { %v801_v2 = vmax.f32 %v746_v1, 0.0 }
 0x2c5   :  { %833 = vst.msk [vmem:[%s1516_s9 + $0xa0] sm:$0xff] %vm76_vm0, %v801_v2 }
 0x2c8   :  { %v748_v3 = vpop.f32.mrf.mxu3 }
 0x2c9   :  { %v749_v4 = vadd.f32 %v1330_v58, %v748_v3 }
 0x2cb   :  { %v802_v5 = vmax.f32 %v749_v4, 0.0 }
 0x2cd   :  { %834 = vst.msk [vmem:[%s1516_s9 + $0xa8] sm:$0xff] %vm76_vm0, %v802_v5 }
 0x2d0   :  { %v751_v6 = vpop.f32.mrf.mxu3 }
 0x2d1   :  { %v752_v7 = vadd.f32 %v1330_v58, %v751_v6 }
 0x2d3   :  { %v803_v8 = vmax.f32 %v752_v7, 0.0 }
 0x2d5   :  { %835 = vst.msk [vmem:[%s1516_s9 + $0xb0] sm:$0xff] %vm76_vm0, %v803_v8 }
 0x2d8   :  { %v754_v9 = vpop.f32.mrf.mxu3 }
 0x2d9   :  { %v755_v10 = vadd.f32 %v1330_v58, %v754_v9 }
 0x2db   :  { %v804_v11 = vmax.f32 %v755_v10, 0.0 }
 0x2dd   :  { %836 = vst.msk [vmem:[%s1516_s9 + $0xb8] sm:$0xff] %vm76_vm0, %v804_v11 }
 0x2e0   :  { %v757_v12 = vpop.f32.mrf.mxu3 }
 0x2e1   :  { %v758_v13 = vadd.f32 %v1330_v58, %v757_v12 }
 0x2e3   :  { %v805_v14 = vmax.f32 %v758_v13, 0.0 }
 0x2e5   :  { %837 = vst.msk [vmem:[%s1516_s9 + $0xc0] sm:$0xff] %vm76_vm0, %v805_v14 }
 0x2e8   :  { %v760_v15 = vpop.f32.mrf.mxu3 }
 0x2e9   :  { %v761_v16 = vadd.f32 %v1330_v58, %v760_v15 }
 0x2eb   :  { %v806_v17 = vmax.f32 %v761_v16, 0.0 }
 0x2ed   :  { %838 = vst.msk [vmem:[%s1516_s9 + $0xc8] sm:$0xff] %vm76_vm0, %v806_v17 }
 0x2f0   :  { %v763_v18 = vpop.f32.mrf.mxu3 }
 0x2f1   :  { %v764_v19 = vadd.f32 %v1330_v58, %v763_v18 }
 0x2f3   :  { %v807_v20 = vmax.f32 %v764_v19, 0.0 }
 0x2f5   :  { %839 = vst.msk [vmem:[%s1516_s9 + $0xd0] sm:$0xff] %vm76_vm0, %v807_v20 }
 0x2f8   :  { %v766_v21 = vpop.f32.mrf.mxu3 }
 0x2f9   :  { %v767_v22 = vadd.f32 %v1330_v58, %v766_v21 }
 0x2fb   :  { %v808_v23 = vmax.f32 %v767_v22, 0.0 }
 0x2fd   :  { %840 = vst.msk [vmem:[%s1516_s9 + $0xd8] sm:$0xff] %vm76_vm0, %v808_v23 }
 0x300   :  { %v769_v24 = vpop.f32.mrf.mxu3 }
 0x301   :  { %v770_v25 = vadd.f32 %v1330_v58, %v769_v24 }
 0x303   :  { %v809_v26 = vmax.f32 %v770_v25, 0.0 }
 0x305   :  { %841 = vst.msk [vmem:[%s1516_s9 + $0xe0] sm:$0xff] %vm76_vm0, %v809_v26 }
 0x308   :  { %v772_v27 = vpop.f32.mrf.mxu3 }
 0x309   :  { %v773_v28 = vadd.f32 %v1330_v58, %v772_v27 }
 0x30b   :  { %v810_v29 = vmax.f32 %v773_v28, 0.0 }
 0x30d   :  { %842 = vst.msk [vmem:[%s1516_s9 + $0xe8] sm:$0xff] %vm76_vm0, %v810_v29 }
 0x310   :  { %v775_v30 = vpop.f32.mrf.mxu3 }
 0x311   :  { %v776_v31 = vadd.f32 %v1330_v58, %v775_v30 }
 0x313   :  { %v811_v32 = vmax.f32 %v776_v31, 0.0 }
 0x315   :  { %843 = vst.msk [vmem:[%s1516_s9 + $0xf0] sm:$0xff] %vm76_vm0, %v811_v32 }
 0x318   :  { %v778_v33 = vpop.f32.mrf.mxu3 }
 0x319   :  { %v779_v34 = vadd.f32 %v1330_v58, %v778_v33 }
 0x31b   :  { %v812_v35 = vmax.f32 %v779_v34, 0.0 }
 0x31d   :  { %844 = vst.msk [vmem:[%s1516_s9 + $0xf8] sm:$0xff] %vm76_vm0, %v812_v35 }

// kernel: tpu_custom_call.1
= control target key start
LH: loop header
LB: loop body
LE: loop exit
PB: predicated region body
PF: predicated region fallthrough
CT: control target
= control target key end

     0   :  { %vm76_vm0 = vcmask 523264   ;;  %s1507_s1 = inlined_call_operand.vmem [shape: f32[64,128], index: 1, kind: input, shape index: {}]   ;;  %s1508_s2 = inlined_call_operand.vmem [shape: f32[1,128], index: 2, kind: input, shape index: {}]   ;;  %s1509_s0 = inlined_call_operand.vmem [shape: f32[256,64], index: 0, kind: input, shape index: {}]   ;;  %s1510_s3 = inlined_call_operand.vmem [shape: f32[128,128], index: 3, kind: input, shape index: {}]   ;;  %s1511_s4 = inlined_call_operand.vmem [shape: f32[1,128], index: 4, kind: input, shape index: {}]   ;;  %s1512_s5 = inlined_call_operand.vmem [shape: f32[128,128], index: 5, kind: input, shape index: {}]   ;;  %s1513_s6 = inlined_call_operand.vmem [shape: f32[1,128], index: 6, kind: input, shape index: {}]   ;;  %s1514_s7 = inlined_call_operand.vmem [shape: f32[128,64], index: 7, kind: input, shape index: {}]   ;;  %s1515_s8 = inlined_call_operand.vmem [shape: f32[1,64], index: 8, kind: input, shape index: {}]   ;;  %s1516_s9 = inlined_call_operand.vmem [shape: f32[256,64], index: 9, kind: output, shape index: {}]  }
   0x1   :  { %v71_v0 = vld [vmem:[%s1507_s1 + $0x38] sm:$0xff]  ;;  %v70_v1 = vld [vmem:[%s1507_s1 + $0x30] sm:$0xff]  ;;  %v69_v2 = vld [vmem:[%s1507_s1 + $0x28] sm:$0xff] }
   0x2   :  { %181 = vmatpush.msra.mxu0 %v71_v0  ;;  %v68_v3 = vld [vmem:[%s1507_s1 + $0x20] sm:$0xff]  ;;  %v67_v4 = vld [vmem:[%s1507_s1 + $0x18] sm:$0xff]  ;;  %v66_v5 = vld [vmem:[%s1507_s1 + $0x10] sm:$0xff] }
   0x3   :  { %v65_v6 = vld [vmem:[%s1507_s1 + $0x8] sm:$0xff]  ;;  %v64_v7 = vld [vmem:[%s1507_s1] sm:$0xff]  ;;  %v34_v10 = vld [vmem:[%s1509_s0 + $0x10] sm:$0xff] }
   0x4   :  { %182 = vmatpush.msra.mxu0 %v70_v1  ;;  %v32_v8 = vld [vmem:[%s1509_s0] sm:$0xff]  ;;  %v33_v9 = vld [vmem:[%s1509_s0 + $0x8] sm:$0xff]  ;;  %v35_v11 = vld [vmem:[%s1509_s0 + $0x18] sm:$0xff] }
   0x5   :  { %v36_v12 = vld [vmem:[%s1509_s0 + $0x20] sm:$0xff]  ;;  %v37_v13 = vld [vmem:[%s1509_s0 + $0x28] sm:$0xff]  ;;  %v38_v14 = vld [vmem:[%s1509_s0 + $0x30] sm:$0xff] }
   0x6   :  { %183 = vmatpush.msra.mxu0 %v69_v2  ;;  %v39_v15 = vld [vmem:[%s1509_s0 + $0x38] sm:$0xff]  ;;  %v40_v16 = vld [vmem:[%s1509_s0 + $0x40] sm:$0xff]  ;;  %v332_v18 = vld [vmem:[%s1510_s3 + $0x70] sm:$0xff] }
   0x7   :  { %v333_v17 = vld [vmem:[%s1510_s3 + $0x78] sm:$0xff]  ;;  %v331_v19 = vld [vmem:[%s1510_s3 + $0x68] sm:$0xff]  ;;  %v330_v21 = vld [vmem:[%s1510_s3 + $0x60] sm:$0xff] }
   0x8   :  { %184 = vmatpush.msra.mxu0 %v68_v3  ;;  %338 = vmatpush.msra.mxu1 %v333_v17  ;;  %v41_v20 = vld [vmem:[%s1509_s0 + $0x48] sm:$0xff]  ;;  %v329_v22 = vld [vmem:[%s1510_s3 + $0x58] sm:$0xff]  ;;  %v328_v23 = vld [vmem:[%s1510_s3 + $0x50] sm:$0xff] }
   0x9   :  { %v327_v24 = vld [vmem:[%s1510_s3 + $0x48] sm:$0xff]  ;;  %v42_v25 = vld [vmem:[%s1509_s0 + $0x50] sm:$0xff]  ;;  %v326_v26 = vld [vmem:[%s1510_s3 + $0x40] sm:$0xff] }
   0xa   :  { %185 = vmatpush.msra.mxu0 %v67_v4  ;;  %339 = vmatpush.msra.mxu1 %v332_v18  ;;  %v325_v27 = vld [vmem:[%s1510_s3 + $0x38] sm:$0xff]  ;;  %v324_v28 = vld [vmem:[%s1510_s3 + $0x30] sm:$0xff]  ;;  %v323_v29 = vld [vmem:[%s1510_s3 + $0x28] sm:$0xff] }
   0xb   :  { %v43_v30 = vld [vmem:[%s1509_s0 + $0x58] sm:$0xff]  ;;  %v322_v31 = vld [vmem:[%s1510_s3 + $0x20] sm:$0xff]  ;;  %v320_v33 = vld [vmem:[%s1510_s3 + $0x10] sm:$0xff] }
   0xc   :  { %186 = vmatpush.msra.mxu0 %v66_v5  ;;  %340 = vmatpush.msra.mxu1 %v331_v19  ;;  %v321_v32 = vld [vmem:[%s1510_s3 + $0x18] sm:$0xff]  ;;  %v44_v34 = vld [vmem:[%s1509_s0 + $0x60] sm:$0xff]  ;;  %v319_v35 = vld [vmem:[%s1510_s3 + $0x8] sm:$0xff] }
   0xd   :  { %v318_v36 = vld [vmem:[%s1510_s3] sm:$0xff]  ;;  %v45_v37 = vld [vmem:[%s1509_s0 + $0x68] sm:$0xff]  ;;  %v46_v38 = vld [vmem:[%s1509_s0 + $0x70] sm:$0xff] }
   0xe   :  { %187 = vmatpush.msra.mxu0 %v65_v6  ;;  %341 = vmatpush.msra.mxu1 %v330_v21  ;;  %v47_v39 = vld [vmem:[%s1509_s0 + $0x78] sm:$0xff]  ;;  %v1074_v40 = vld [vmem:[%s1508_s2] ss:$0 sm:$0xff]  ;;  %v49_v46 = vld [vmem:[%s1509_s0 + $0x88] sm:$0xff] }
   0xf   :  { %v48_v42 = vld [vmem:[%s1509_s0 + $0x80] sm:$0xff]  ;;  %v50_v50 = vld [vmem:[%s1509_s0 + $0x90] sm:$0xff]  ;;  %v51_v54 = vld [vmem:[%s1509_s0 + $0x98] sm:$0xff] }
  0x10   :  { %188 = vmatpush.msra.mxu0 %v64_v7  ;;  %342 = vmatpush.msra.mxu1 %v329_v22  ;;  %v52_v58 = vld [vmem:[%s1509_s0 + $0xa0] sm:$0xff]  ;;  %v53_v62 = vld [vmem:[%s1509_s0 + $0xa8] sm:$0xff]  ;;  %v54_v2 = vld [vmem:[%s1509_s0 + $0xb0] sm:$0xff] }
  0x11   :  { %849 = vmatmul.msk.f32.vlgmr.msra.gmra.mxu0 %vm76_vm0, %v32_v8  ;;  %v55_v6 = vld [vmem:[%s1509_s0 + $0xb8] sm:$0xff]  ;;  %v497_v17 = vld [vmem:[%s1512_s5 + $0x70] sm:$0xff]  ;;  %v496_v19 = vld [vmem:[%s1512_s5 + $0x68] sm:$0xff] }
  0x12   :  { %343 = vmatpush.msra.mxu1 %v328_v23  ;;  %v494_v21 = vld [vmem:[%s1512_s5 + $0x58] sm:$0xff]  ;;  %v58_v23 = vld [vmem:[%s1509_s0 + $0xd0] sm:$0xff] }
  0x14   :  { %344 = vmatpush.msra.mxu1 %v327_v24 }
  0x16   :  { %345 = vmatpush.msra.mxu1 %v326_v26 }
  0x18   :  { %346 = vmatpush.msra.mxu1 %v325_v27  ;;  %v492_v27 = vld [vmem:[%s1512_s5 + $0x48] sm:$0xff] }
  0x19   :  { %850 = vmatmul.msk.f32.gmra.mxu0 %vm76_vm0, %v33_v9 }
  0x1a   :  { %347 = vmatpush.msra.mxu1 %v324_v28  ;;  %v491_v28 = vld [vmem:[%s1512_s5 + $0x40] sm:$0xff] }
  0x1c   :  { %348 = vmatpush.msra.mxu1 %v323_v29  ;;  %v490_v29 = vld [vmem:[%s1512_s5 + $0x38] sm:$0xff] }
  0x1e   :  { %349 = vmatpush.msra.mxu1 %v322_v31  ;;  %v59_v31 = vld [vmem:[%s1509_s0 + $0xd8] sm:$0xff] }
  0x20   :  { %350 = vmatpush.msra.mxu1 %v321_v32 }
  0x21   :  { %851 = vmatmul.msk.f32.gmra.mxu0 %vm76_vm0, %v34_v10  ;;  %v56_v10 = vld [vmem:[%s1509_s0 + $0xc0] sm:$0xff] }
  0x22   :  { %351 = vmatpush.msra.mxu1 %v320_v33  ;;  %v489_v33 = vld [vmem:[%s1512_s5 + $0x30] sm:$0xff] }
  0x24   :  { %352 = vmatpush.msra.mxu1 %v319_v35  ;;  %v488_v35 = vld [vmem:[%s1512_s5 + $0x28] sm:$0xff] }
  0x26   :  { %353 = vmatpush.msra.mxu1 %v318_v36  ;;  %v487_v36 = vld [vmem:[%s1512_s5 + $0x20] sm:$0xff] }
  0x29   :  { %852 = vmatmul.msk.f32.gmra.mxu0 %vm76_vm0, %v35_v11 }
  0x31   :  { %853 = vmatmul.msk.f32.gmra.mxu0 %vm76_vm0, %v36_v12 }
  0x39   :  { %854 = vmatmul.msk.f32.gmra.mxu0 %vm76_vm0, %v37_v13  ;;  %v498_v13 = vld [vmem:[%s1512_s5 + $0x78] sm:$0xff] }
  0x3a   :  { %503 = vmatpush.msra.mxu2 %v498_v13 }
  0x3c   :  { %504 = vmatpush.msra.mxu2 %v497_v17 }
  0x3e   :  { %505 = vmatpush.msra.mxu2 %v496_v19 }
  0x41   :  { %855 = vmatmul.msk.f32.gmra.mxu0 %vm76_vm0, %v38_v14 }
  0x49   :  { %856 = vmatmul.msk.f32.gmra.mxu0 %vm76_vm0, %v39_v15  ;;  %v57_v15 = vld [vmem:[%s1509_s0 + $0xc8] sm:$0xff] }
  0x51   :  { %857 = vmatmul.msk.f32.gmra.mxu0 %vm76_vm0, %v40_v16 }
  0x59   :  { %858 = vmatmul.msk.f32.gmra.mxu0 %vm76_vm0, %v41_v20  ;;  %v495_v20 = vld [vmem:[%s1512_s5 + $0x60] sm:$0xff] }
  0x5a   :  { %506 = vmatpush.msra.mxu2 %v495_v20 }
  0x5c   :  { %507 = vmatpush.msra.mxu2 %v494_v21 }
  0x61   :  { %859 = vmatmul.msk.f32.gmra.mxu0 %vm76_vm0, %v42_v25  ;;  %v493_v25 = vld [vmem:[%s1512_s5 + $0x50] sm:$0xff] }
  0x62   :  { %508 = vmatpush.msra.mxu2 %v493_v25 }
  0x64   :  { %509 = vmatpush.msra.mxu2 %v492_v27 }
  0x66   :  { %510 = vmatpush.msra.mxu2 %v491_v28 }
  0x68   :  { %511 = vmatpush.msra.mxu2 %v490_v29 }
  0x69   :  { %860 = vmatmul.msk.f32.gmra.mxu0 %vm76_vm0, %v43_v30 }
  0x6a   :  { %512 = vmatpush.msra.mxu2 %v489_v33 }
  0x6c   :  { %513 = vmatpush.msra.mxu2 %v488_v35 }
  0x6e   :  { %514 = vmatpush.msra.mxu2 %v487_v36 }
  0x71   :  { %861 = vmatmul.msk.f32.gmra.mxu0 %vm76_vm0, %v44_v34 }
  0x79   :  { %862 = vmatmul.msk.f32.gmra.mxu0 %vm76_vm0, %v45_v37  ;;  %v486_v37 = vld [vmem:[%s1512_s5 + $0x18] sm:$0xff] }
  0x7a   :  { %515 = vmatpush.msra.mxu2 %v486_v37 }
  0x81   :  { %863 = vmatmul.msk.f32.gmra.mxu0 %vm76_vm0, %v46_v38 }
  0x89   :  { %864 = vmatmul.msk.f32.gmra.mxu0 %vm76_vm0, %v47_v39  ;;  %v60_v39 = vld [vmem:[%s1509_s0 + $0xe0] sm:$0xff] }
  0x8e   :  { %v190_v41 = vpop.f32.mrf.mxu0 }
  0x8f   :  { %v191_v43 = vadd.f32 %v1074_v40, %v190_v41 }
  0x91   :  { %865 = vmatmul.msk.f32.gmra.mxu0 %vm76_vm0, %v48_v42  ;;  %v286_v44 = vmax.f32 %v191_v43, 0.0  ;;  %v485_v42 = vld [vmem:[%s1512_s5 + $0x10] sm:$0xff] }
  0x92   :  { %516 = vmatpush.msra.mxu2 %v485_v42 }
  0x93   :  { %354 = vmatmul.f32.vlgmr.msra.gmra.mxu1 %v286_v44  ;;  %v484_v44 = vld [vmem:[%s1512_s5 + $0x8] sm:$0xff] }
  0x94   :  { %517 = vmatpush.msra.mxu2 %v484_v44 }
  0x96   :  { %v193_v45 = vpop.f32.mrf.mxu0 }
  0x97   :  { %v194_v47 = vadd.f32 %v1074_v40, %v193_v45  ;;  %v483_v45 = vld [vmem:[%s1512_s5] sm:$0xff] }
  0x98   :  { %518 = vmatpush.msra.mxu2 %v483_v45 }
  0x99   :  { %866 = vmatmul.msk.f32.gmra.mxu0 %vm76_vm0, %v49_v46  ;;  %v287_v48 = vmax.f32 %v194_v47, 0.0  ;;  %v61_v47 = vld [vmem:[%s1509_s0 + $0xe8] sm:$0xff] }
  0x9b   :  { %357 = vmatmul.f32.gmra.mxu1 %v287_v48 }
  0x9e   :  { %v196_v49 = vpop.f32.mrf.mxu0 }
  0x9f   :  { %v197_v51 = vadd.f32 %v1074_v40, %v196_v49 }
  0xa1   :  { %867 = vmatmul.msk.f32.gmra.mxu0 %vm76_vm0, %v50_v50  ;;  %v288_v52 = vmax.f32 %v197_v51, 0.0  ;;  %v62_v51 = vld [vmem:[%s1509_s0 + $0xf0] sm:$0xff] }
  0xa3   :  { %360 = vmatmul.f32.gmra.mxu1 %v288_v52 }
  0xa6   :  { %v199_v53 = vpop.f32.mrf.mxu0 }
  0xa7   :  { %v200_v55 = vadd.f32 %v1074_v40, %v199_v53 }
  0xa9   :  { %868 = vmatmul.msk.f32.gmra.mxu0 %vm76_vm0, %v51_v54  ;;  %v289_v56 = vmax.f32 %v200_v55, 0.0  ;;  %v63_v55 = vld [vmem:[%s1509_s0 + $0xf8] sm:$0xff] }
  0xab   :  { %363 = vmatmul.f32.gmra.mxu1 %v289_v56 }
  0xae   :  { %v202_v57 = vpop.f32.mrf.mxu0 }
  0xaf   :  { %v203_v59 = vadd.f32 %v1074_v40, %v202_v57 }
  0xb1   :  { %869 = vmatmul.msk.f32.gmra.mxu0 %vm76_vm0, %v52_v58  ;;  %v290_v60 = vmax.f32 %v203_v59, 0.0  ;;  %v1207_v58 = vld [vmem:[%s1511_s4] ss:$0 sm:$0xff] }
  0xb3   :  { %366 = vmatmul.f32.gmra.mxu1 %v290_v60 }
  0xb6   :  { %v205_v61 = vpop.f32.mrf.mxu0 }
  0xb7   :  { %v206_v63 = vadd.f32 %v1074_v40, %v205_v61 }
  0xb9   :  { %870 = vmatmul.msk.f32.gmra.mxu0 %vm76_vm0, %v53_v62  ;;  %v291_v0 = vmax.f32 %v206_v63, 0.0 }
  0xbb   :  { %369 = vmatmul.f32.gmra.mxu1 %v291_v0 }
  0xbe   :  { %v208_v1 = vpop.f32.mrf.mxu0 }
  0xbf   :  { %v209_v3 = vadd.f32 %v1074_v40, %v208_v1 }
  0xc1   :  { %871 = vmatmul.msk.f32.gmra.mxu0 %vm76_vm0, %v54_v2  ;;  %v292_v4 = vmax.f32 %v209_v3, 0.0 }
  0xc3   :  { %372 = vmatmul.f32.gmra.mxu1 %v292_v4 }
  0xc6   :  { %v211_v5 = vpop.f32.mrf.mxu0 }
  0xc7   :  { %v212_v7 = vadd.f32 %v1074_v40, %v211_v5 }
  0xc9   :  { %872 = vmatmul.msk.f32.gmra.mxu0 %vm76_vm0, %v55_v6  ;;  %v293_v8 = vmax.f32 %v212_v7, 0.0 }
  0xcb   :  { %375 = vmatmul.f32.gmra.mxu1 %v293_v8 }
  0xce   :  { %v214_v9 = vpop.f32.mrf.mxu0 }
  0xcf   :  { %v215_v11 = vadd.f32 %v1074_v40, %v214_v9 }
  0xd1   :  { %v294_v12 = vmax.f32 %v215_v11, 0.0  ;;  %873 = vmatmul.msk.f32.gmra.mxu0 %vm76_vm0, %v56_v10 }
  0xd3   :  { %378 = vmatmul.f32.gmra.mxu1 %v294_v12 }
  0xd6   :  { %v217_v14 = vpop.f32.mrf.mxu0 }
  0xd7   :  { %v218_v16 = vadd.f32 %v1074_v40, %v217_v14 }
  0xd9   :  { %v295_v18 = vmax.f32 %v218_v16, 0.0  ;;  %874 = vmatmul.msk.f32.gmra.mxu0 %vm76_vm0, %v57_v15 }
  0xdb   :  { %381 = vmatmul.f32.gmra.mxu1 %v295_v18 }
  0xde   :  { %v220_v22 = vpop.f32.mrf.mxu0 }
  0xdf   :  { %v221_v24 = vadd.f32 %v1074_v40, %v220_v22 }
  0xe1   :  { %v296_v26 = vmax.f32 %v221_v24, 0.0  ;;  %875 = vmatmul.msk.f32.gmra.mxu0 %vm76_vm0, %v58_v23 }
  0xe3   :  { %384 = vmatmul.f32.gmra.mxu1 %v296_v26 }
  0xe6   :  { %v223_v30 = vpop.f32.mrf.mxu0 }
  0xe7   :  { %v224_v32 = vadd.f32 %v1074_v40, %v223_v30 }
  0xe9   :  { %v297_v34 = vmax.f32 %v224_v32, 0.0  ;;  %876 = vmatmul.msk.f32.gmra.mxu0 %vm76_vm0, %v59_v31 }
  0xeb   :  { %387 = vmatmul.f32.gmra.mxu1 %v297_v34 }
  0xee   :  { %v226_v38 = vpop.f32.mrf.mxu0 }
  0xef   :  { %v227_v41 = vadd.f32 %v1074_v40, %v226_v38 }
  0xf1   :  { %v298_v43 = vmax.f32 %v227_v41, 0.0  ;;  %877 = vmatmul.msk.f32.gmra.mxu0 %vm76_vm0, %v60_v39 }
  0xf3   :  { %390 = vmatmul.f32.gmra.mxu1 %v298_v43 }
  0xf6   :  { %v229_v46 = vpop.f32.mrf.mxu0 }
  0xf7   :  { %v230_v48 = vadd.f32 %v1074_v40, %v229_v46 }
  0xf9   :  { %v299_v49 = vmax.f32 %v230_v48, 0.0  ;;  %878 = vmatmul.msk.f32.gmra.mxu0 %vm76_vm0, %v61_v47 }
  0xfb   :  { %393 = vmatmul.f32.gmra.mxu1 %v299_v49 }
  0xfe   :  { %v232_v50 = vpop.f32.mrf.mxu0 }
  0xff   :  { %v233_v52 = vadd.f32 %v1074_v40, %v232_v50 }
 0x101   :  { %v300_v53 = vmax.f32 %v233_v52, 0.0  ;;  %879 = vmatmul.msk.f32.gmra.mxu0 %vm76_vm0, %v62_v51 }
 0x103   :  { %396 = vmatmul.f32.gmra.mxu1 %v300_v53 }
 0x106   :  { %v235_v54 = vpop.f32.mrf.mxu0 }
 0x107   :  { %v236_v56 = vadd.f32 %v1074_v40, %v235_v54 }
 0x109   :  { %v301_v57 = vmax.f32 %v236_v56, 0.0  ;;  %880 = vmatmul.msk.f32.gmra.mxu0 %vm76_vm0, %v63_v55  ;;  %v663_v56 = vld [vmem:[%s1514_s7 + $0x78] sm:$0xff] }
 0x10a   :  { %668 = vmatpush.msra.mxu3 %v663_v56 }
 0x10b   :  { %399 = vmatmul.f32.gmra.mxu1 %v301_v57 }
 0x10e   :  { %v238_v59 = vpop.f32.mrf.mxu0 }
 0x10f   :  { %v239_v60 = vadd.f32 %v1074_v40, %v238_v59 }
 0x110   :  { %v355_v61 = vpop.f32.mrf.mxu1 }
 0x111   :  { %v302_v62 = vmax.f32 %v239_v60, 0.0  ;;  %v356_v63 = vadd.f32 %v1207_v58, %v355_v61  ;;  %v662_v60 = vld [vmem:[%s1514_s7 + $0x70] sm:$0xff] }
 0x112   :  { %669 = vmatpush.msra.mxu3 %v662_v60 }
 0x113   :  { %402 = vmatmul.f32.gmra.mxu1 %v302_v62  ;;  %v451_v0 = vmax.f32 %v356_v63, 0.0 }
 0x115   :  { %519 = vmatmul.f32.vlgmr.msra.gmra.mxu2 %v451_v0  ;;  %v661_v0 = vld [vmem:[%s1514_s7 + $0x68] sm:$0xff] }
 0x116   :  { %v241_v1 = vpop.f32.mrf.mxu0  ;;  %670 = vmatpush.msra.mxu3 %v661_v0 }
 0x117   :  { %v242_v2 = vadd.f32 %v1074_v40, %v241_v1 }
 0x118   :  { %v358_v3 = vpop.f32.mrf.mxu1 }
 0x119   :  { %v303_v4 = vmax.f32 %v242_v2, 0.0  ;;  %v359_v5 = vadd.f32 %v1207_v58, %v358_v3  ;;  %v660_v2 = vld [vmem:[%s1514_s7 + $0x60] sm:$0xff]  ;;  %v659_v3 = vld [vmem:[%s1514_s7 + $0x58] sm:$0xff] }
 0x11a   :  { %671 = vmatpush.msra.mxu3 %v660_v2 }
 0x11b   :  { %405 = vmatmul.f32.gmra.mxu1 %v303_v4  ;;  %v452_v6 = vmax.f32 %v359_v5, 0.0 }
 0x11c   :  { %672 = vmatpush.msra.mxu3 %v659_v3 }
 0x11d   :  { %522 = vmatmul.f32.gmra.mxu2 %v452_v6  ;;  %v658_v6 = vld [vmem:[%s1514_s7 + $0x50] sm:$0xff] }
 0x11e   :  { %v244_v7 = vpop.f32.mrf.mxu0  ;;  %673 = vmatpush.msra.mxu3 %v658_v6 }
 0x11f   :  { %v245_v8 = vadd.f32 %v1074_v40, %v244_v7 }
 0x120   :  { %v361_v9 = vpop.f32.mrf.mxu1 }
 0x121   :  { %v304_v10 = vmax.f32 %v245_v8, 0.0  ;;  %v362_v11 = vadd.f32 %v1207_v58, %v361_v9 }
 0x123   :  { %408 = vmatmul.f32.gmra.mxu1 %v304_v10  ;;  %v453_v12 = vmax.f32 %v362_v11, 0.0  ;;  %v657_v10 = vld [vmem:[%s1514_s7 + $0x48] sm:$0xff] }
 0x124   :  { %674 = vmatpush.msra.mxu3 %v657_v10 }
 0x125   :  { %525 = vmatmul.f32.gmra.mxu2 %v453_v12  ;;  %v656_v12 = vld [vmem:[%s1514_s7 + $0x40] sm:$0xff] }
 0x126   :  { %v247_v13 = vpop.f32.mrf.mxu0  ;;  %675 = vmatpush.msra.mxu3 %v656_v12 }
 0x127   :  { %v248_v14 = vadd.f32 %v1074_v40, %v247_v13  ;;  %v655_v13 = vld [vmem:[%s1514_s7 + $0x38] sm:$0xff] }
 0x128   :  { %v364_v15 = vpop.f32.mrf.mxu1  ;;  %676 = vmatpush.msra.mxu3 %v655_v13 }
 0x129   :  { %v305_v16 = vmax.f32 %v248_v14, 0.0  ;;  %v365_v17 = vadd.f32 %v1207_v58, %v364_v15 }
 0x12b   :  { %411 = vmatmul.f32.gmra.mxu1 %v305_v16  ;;  %v454_v18 = vmax.f32 %v365_v17, 0.0  ;;  %v654_v16 = vld [vmem:[%s1514_s7 + $0x30] sm:$0xff] }
 0x12c   :  { %677 = vmatpush.msra.mxu3 %v654_v16 }
 0x12d   :  { %528 = vmatmul.f32.gmra.mxu2 %v454_v18 }
 0x12e   :  { %v250_v19 = vpop.f32.mrf.mxu0 }
 0x12f   :  { %v251_v20 = vadd.f32 %v1074_v40, %v250_v19 }
 0x130   :  { %v367_v21 = vpop.f32.mrf.mxu1 }
 0x131   :  { %v306_v22 = vmax.f32 %v251_v20, 0.0  ;;  %v368_v23 = vadd.f32 %v1207_v58, %v367_v21  ;;  %v653_v20 = vld [vmem:[%s1514_s7 + $0x28] sm:$0xff] }
 0x132   :  { %678 = vmatpush.msra.mxu3 %v653_v20 }
 0x133   :  { %414 = vmatmul.f32.gmra.mxu1 %v306_v22  ;;  %v455_v24 = vmax.f32 %v368_v23, 0.0  ;;  %v652_v22 = vld [vmem:[%s1514_s7 + $0x20] sm:$0xff]  ;;  %v651_v23 = vld [vmem:[%s1514_s7 + $0x18] sm:$0xff] }
 0x134   :  { %679 = vmatpush.msra.mxu3 %v652_v22 }
 0x135   :  { %531 = vmatmul.f32.gmra.mxu2 %v455_v24 }
 0x136   :  { %v253_v25 = vpop.f32.mrf.mxu0  ;;  %680 = vmatpush.msra.mxu3 %v651_v23 }
 0x137   :  { %v254_v26 = vadd.f32 %v1074_v40, %v253_v25 }
 0x138   :  { %v370_v27 = vpop.f32.mrf.mxu1 }
 0x139   :  { %v307_v28 = vmax.f32 %v254_v26, 0.0  ;;  %v371_v29 = vadd.f32 %v1207_v58, %v370_v27  ;;  %v650_v26 = vld [vmem:[%s1514_s7 + $0x10] sm:$0xff] }
 0x13a   :  { %681 = vmatpush.msra.mxu3 %v650_v26 }
 0x13b   :  { %417 = vmatmul.f32.gmra.mxu1 %v307_v28  ;;  %v456_v30 = vmax.f32 %v371_v29, 0.0 }
 0x13d   :  { %534 = vmatmul.f32.gmra.mxu2 %v456_v30  ;;  %v649_v30 = vld [vmem:[%s1514_s7 + $0x8] sm:$0xff] }
 0x13e   :  { %v256_v31 = vpop.f32.mrf.mxu0  ;;  %682 = vmatpush.msra.mxu3 %v649_v30 }
 0x13f   :  { %v257_v32 = vadd.f32 %v1074_v40, %v256_v31 }
 0x140   :  { %v373_v33 = vpop.f32.mrf.mxu1 }
 0x141   :  { %v308_v34 = vmax.f32 %v257_v32, 0.0  ;;  %v374_v35 = vadd.f32 %v1207_v58, %v373_v33  ;;  %v648_v32 = vld [vmem:[%s1514_s7] sm:$0xff] }
 0x142   :  { %683 = vmatpush.msra.mxu3 %v648_v32 }
 0x143   :  { %420 = vmatmul.f32.gmra.mxu1 %v308_v34  ;;  %v457_v36 = vmax.f32 %v374_v35, 0.0 }
 0x145   :  { %537 = vmatmul.f32.gmra.mxu2 %v457_v36 }
 0x146   :  { %v259_v37 = vpop.f32.mrf.mxu0 }
 0x147   :  { %v260_v38 = vadd.f32 %v1074_v40, %v259_v37 }
 0x148   :  { %v376_v39 = vpop.f32.mrf.mxu1 }
 0x149   :  { %v309_v41 = vmax.f32 %v260_v38, 0.0  ;;  %v377_v42 = vadd.f32 %v1207_v58, %v376_v39 }
 0x14b   :  { %423 = vmatmul.f32.gmra.mxu1 %v309_v41  ;;  %v458_v43 = vmax.f32 %v377_v42, 0.0 }
 0x14d   :  { %540 = vmatmul.f32.gmra.mxu2 %v458_v43 }
 0x14e   :  { %v262_v44 = vpop.f32.mrf.mxu0 }
 0x14f   :  { %v263_v45 = vadd.f32 %v1074_v40, %v262_v44 }
 0x150   :  { %v379_v46 = vpop.f32.mrf.mxu1 }
 0x151   :  { %v310_v47 = vmax.f32 %v263_v45, 0.0  ;;  %v380_v48 = vadd.f32 %v1207_v58, %v379_v46 }
 0x153   :  { %v459_v49 = vmax.f32 %v380_v48, 0.0  ;;  %426 = vmatmul.f32.gmra.mxu1 %v310_v47 }
 0x155   :  { %543 = vmatmul.f32.gmra.mxu2 %v459_v49  ;;  %v1293_v49 = vld [vmem:[%s1513_s6] ss:$0 sm:$0xff] }
 0x156   :  { %v265_v50 = vpop.f32.mrf.mxu0 }
 0x157   :  { %v266_v51 = vadd.f32 %v1074_v40, %v265_v50 }
 0x158   :  { %v382_v52 = vpop.f32.mrf.mxu1 }
 0x159   :  { %v311_v53 = vmax.f32 %v266_v51, 0.0  ;;  %v383_v54 = vadd.f32 %v1207_v58, %v382_v52 }
 0x15b   :  { %v460_v55 = vmax.f32 %v383_v54, 0.0  ;;  %429 = vmatmul.f32.gmra.mxu1 %v311_v53 }
 0x15d   :  { %546 = vmatmul.f32.gmra.mxu2 %v460_v55 }
 0x15e   :  { %v268_v57 = vpop.f32.mrf.mxu0 }
 0x15f   :  { %v269_v59 = vadd.f32 %v1074_v40, %v268_v57 }
 0x160   :  { %v385_v61 = vpop.f32.mrf.mxu1 }
 0x161   :  { %v312_v62 = vmax.f32 %v269_v59, 0.0  ;;  %v386_v63 = vadd.f32 %v1207_v58, %v385_v61 }
 0x163   :  { %v461_v1 = vmax.f32 %v386_v63, 0.0  ;;  %432 = vmatmul.f32.gmra.mxu1 %v312_v62 }
 0x165   :  { %549 = vmatmul.f32.gmra.mxu2 %v461_v1 }
 0x166   :  { %v271_v4 = vpop.f32.mrf.mxu0 }
 0x167   :  { %v272_v5 = vadd.f32 %v1074_v40, %v271_v4 }
 0x168   :  { %v388_v7 = vpop.f32.mrf.mxu1 }
 0x169   :  { %v313_v8 = vmax.f32 %v272_v5, 0.0  ;;  %v389_v9 = vadd.f32 %v1207_v58, %v388_v7 }
 0x16b   :  { %v462_v11 = vmax.f32 %v389_v9, 0.0  ;;  %435 = vmatmul.f32.gmra.mxu1 %v313_v8 }
 0x16d   :  { %552 = vmatmul.f32.gmra.mxu2 %v462_v11 }
 0x16e   :  { %v274_v14 = vpop.f32.mrf.mxu0 }
 0x16f   :  { %v275_v15 = vadd.f32 %v1074_v40, %v274_v14 }
 0x170   :  { %v391_v17 = vpop.f32.mrf.mxu1 }
 0x171   :  { %v314_v18 = vmax.f32 %v275_v15, 0.0  ;;  %v392_v19 = vadd.f32 %v1207_v58, %v391_v17 }
 0x173   :  { %v463_v21 = vmax.f32 %v392_v19, 0.0  ;;  %438 = vmatmul.f32.gmra.mxu1 %v314_v18 }
 0x175   :  { %555 = vmatmul.f32.gmra.mxu2 %v463_v21 }
 0x176   :  { %v277_v24 = vpop.f32.mrf.mxu0 }
 0x177   :  { %v278_v25 = vadd.f32 %v1074_v40, %v277_v24 }
 0x178   :  { %v394_v27 = vpop.f32.mrf.mxu1 }
 0x179   :  { %v315_v28 = vmax.f32 %v278_v25, 0.0  ;;  %v395_v29 = vadd.f32 %v1207_v58, %v394_v27 }
 0x17b   :  { %v464_v31 = vmax.f32 %v395_v29, 0.0  ;;  %441 = vmatmul.f32.gmra.mxu1 %v315_v28 }
 0x17d   :  { %558 = vmatmul.f32.gmra.mxu2 %v464_v31 }
 0x17e   :  { %v280_v33 = vpop.f32.mrf.mxu0 }
 0x17f   :  { %v281_v34 = vadd.f32 %v1074_v40, %v280_v33 }
 0x180   :  { %v397_v35 = vpop.f32.mrf.mxu1 }
 0x181   :  { %v316_v36 = vmax.f32 %v281_v34, 0.0  ;;  %v398_v37 = vadd.f32 %v1207_v58, %v397_v35 }
 0x183   :  { %v465_v38 = vmax.f32 %v398_v37, 0.0  ;;  %444 = vmatmul.f32.gmra.mxu1 %v316_v36 }
 0x185   :  { %561 = vmatmul.f32.gmra.mxu2 %v465_v38 }
 0x186   :  { %v283_v39 = vpop.f32.mrf.mxu0 }
 0x187   :  { %v284_v41 = vadd.f32 %v1074_v40, %v283_v39 }
 0x188   :  { %v400_v42 = vpop.f32.mrf.mxu1 }
 0x189   :  { %v317_v43 = vmax.f32 %v284_v41, 0.0  ;;  %v401_v44 = vadd.f32 %v1207_v58, %v400_v42 }
 0x18b   :  { %v466_v45 = vmax.f32 %v401_v44, 0.0  ;;  %447 = vmatmul.f32.gmra.mxu1 %v317_v43 }
 0x18d   :  { %564 = vmatmul.f32.gmra.mxu2 %v466_v45 }
 0x190   :  { %v403_v46 = vpop.f32.mrf.mxu1 }
 0x191   :  { %v404_v47 = vadd.f32 %v1207_v58, %v403_v46 }
 0x193   :  { %v467_v48 = vmax.f32 %v404_v47, 0.0 }
 0x195   :  { %567 = vmatmul.f32.gmra.mxu2 %v467_v48 }
 0x198   :  { %v406_v50 = vpop.f32.mrf.mxu1  ;;  %v520_v51 = vpop.f32.mrf.mxu2 }
 0x199   :  { %v407_v40 = vadd.f32 %v1207_v58, %v406_v50  ;;  %v521_v52 = vadd.f32 %v1293_v49, %v520_v51 }
 0x19b   :  { %v468_v53 = vmax.f32 %v407_v40, 0.0  ;;  %v616_v54 = vmax.f32 %v521_v52, 0.0 }
 0x19d   :  { %570 = vmatmul.f32.gmra.mxu2 %v468_v53  ;;  %684 = vmatmul.f32.vlgmr.msra.gmra.mxu3 %v616_v54 }
 0x1a0   :  { %v409_v55 = vpop.f32.mrf.mxu1  ;;  %v523_v56 = vpop.f32.mrf.mxu2 }
 0x1a1   :  { %v410_v57 = vadd.f32 %v1207_v58, %v409_v55  ;;  %v524_v59 = vadd.f32 %v1293_v49, %v523_v56 }
 0x1a3   :  { %v469_v60 = vmax.f32 %v410_v57, 0.0  ;;  %v617_v61 = vmax.f32 %v524_v59, 0.0 }
 0x1a5   :  { %573 = vmatmul.f32.gmra.mxu2 %v469_v60  ;;  %687 = vmatmul.f32.gmra.mxu3 %v617_v61 }
 0x1a8   :  { %v412_v62 = vpop.f32.mrf.mxu1  ;;  %v526_v63 = vpop.f32.mrf.mxu2 }
 0x1a9   :  { %v413_v0 = vadd.f32 %v1207_v58, %v412_v62  ;;  %v527_v1 = vadd.f32 %v1293_v49, %v526_v63 }
 0x1ab   :  { %v470_v2 = vmax.f32 %v413_v0, 0.0  ;;  %v618_v3 = vmax.f32 %v527_v1, 0.0 }
 0x1ad   :  { %576 = vmatmul.f32.gmra.mxu2 %v470_v2  ;;  %690 = vmatmul.f32.gmra.mxu3 %v618_v3 }
 0x1b0   :  { %v415_v4 = vpop.f32.mrf.mxu1  ;;  %v529_v5 = vpop.f32.mrf.mxu2 }
 0x1b1   :  { %v416_v6 = vadd.f32 %v1207_v58, %v415_v4  ;;  %v530_v7 = vadd.f32 %v1293_v49, %v529_v5 }
 0x1b3   :  { %v471_v8 = vmax.f32 %v416_v6, 0.0  ;;  %v619_v9 = vmax.f32 %v530_v7, 0.0 }
 0x1b5   :  { %579 = vmatmul.f32.gmra.mxu2 %v471_v8  ;;  %693 = vmatmul.f32.gmra.mxu3 %v619_v9 }
 0x1b8   :  { %v418_v10 = vpop.f32.mrf.mxu1  ;;  %v532_v11 = vpop.f32.mrf.mxu2 }
 0x1b9   :  { %v419_v12 = vadd.f32 %v1207_v58, %v418_v10  ;;  %v533_v13 = vadd.f32 %v1293_v49, %v532_v11 }
 0x1bb   :  { %v472_v14 = vmax.f32 %v419_v12, 0.0  ;;  %v620_v15 = vmax.f32 %v533_v13, 0.0 }
 0x1bd   :  { %582 = vmatmul.f32.gmra.mxu2 %v472_v14  ;;  %696 = vmatmul.f32.gmra.mxu3 %v620_v15 }
 0x1c0   :  { %v421_v16 = vpop.f32.mrf.mxu1  ;;  %v535_v17 = vpop.f32.mrf.mxu2 }
 0x1c1   :  { %v422_v18 = vadd.f32 %v1207_v58, %v421_v16  ;;  %v536_v19 = vadd.f32 %v1293_v49, %v535_v17 }
 0x1c3   :  { %v473_v20 = vmax.f32 %v422_v18, 0.0  ;;  %v621_v21 = vmax.f32 %v536_v19, 0.0 }
 0x1c5   :  { %585 = vmatmul.f32.gmra.mxu2 %v473_v20  ;;  %699 = vmatmul.f32.gmra.mxu3 %v621_v21 }
 0x1c8   :  { %v424_v22 = vpop.f32.mrf.mxu1  ;;  %v538_v23 = vpop.f32.mrf.mxu2 }
 0x1c9   :  { %v425_v24 = vadd.f32 %v1207_v58, %v424_v22  ;;  %v539_v25 = vadd.f32 %v1293_v49, %v538_v23 }
 0x1cb   :  { %v474_v26 = vmax.f32 %v425_v24, 0.0  ;;  %v622_v27 = vmax.f32 %v539_v25, 0.0 }
 0x1cd   :  { %588 = vmatmul.f32.gmra.mxu2 %v474_v26  ;;  %702 = vmatmul.f32.gmra.mxu3 %v622_v27 }
 0x1d0   :  { %v427_v28 = vpop.f32.mrf.mxu1  ;;  %v541_v29 = vpop.f32.mrf.mxu2 }
 0x1d1   :  { %v428_v30 = vadd.f32 %v1207_v58, %v427_v28  ;;  %v542_v31 = vadd.f32 %v1293_v49, %v541_v29 }
 0x1d3   :  { %v475_v32 = vmax.f32 %v428_v30, 0.0  ;;  %v623_v33 = vmax.f32 %v542_v31, 0.0 }
 0x1d5   :  { %591 = vmatmul.f32.gmra.mxu2 %v475_v32  ;;  %705 = vmatmul.f32.gmra.mxu3 %v623_v33 }
 0x1d8   :  { %v430_v34 = vpop.f32.mrf.mxu1  ;;  %v544_v35 = vpop.f32.mrf.mxu2 }
 0x1d9   :  { %v431_v36 = vadd.f32 %v1207_v58, %v430_v34  ;;  %v545_v37 = vadd.f32 %v1293_v49, %v544_v35 }
 0x1db   :  { %v476_v38 = vmax.f32 %v431_v36, 0.0  ;;  %v624_v39 = vmax.f32 %v545_v37, 0.0 }
 0x1dd   :  { %594 = vmatmul.f32.gmra.mxu2 %v476_v38  ;;  %708 = vmatmul.f32.gmra.mxu3 %v624_v39 }
 0x1e0   :  { %v433_v41 = vpop.f32.mrf.mxu1  ;;  %v547_v42 = vpop.f32.mrf.mxu2 }
 0x1e1   :  { %v434_v43 = vadd.f32 %v1207_v58, %v433_v41  ;;  %v548_v44 = vadd.f32 %v1293_v49, %v547_v42 }
 0x1e3   :  { %v477_v45 = vmax.f32 %v434_v43, 0.0  ;;  %v625_v46 = vmax.f32 %v548_v44, 0.0 }
 0x1e5   :  { %597 = vmatmul.f32.gmra.mxu2 %v477_v45  ;;  %711 = vmatmul.f32.gmra.mxu3 %v625_v46 }
 0x1e8   :  { %v436_v47 = vpop.f32.mrf.mxu1  ;;  %v550_v48 = vpop.f32.mrf.mxu2 }
 0x1e9   :  { %v437_v50 = vadd.f32 %v1207_v58, %v436_v47  ;;  %v551_v51 = vadd.f32 %v1293_v49, %v550_v48 }
 0x1eb   :  { %v478_v40 = vmax.f32 %v437_v50, 0.0  ;;  %v626_v52 = vmax.f32 %v551_v51, 0.0 }
 0x1ed   :  { %600 = vmatmul.f32.gmra.mxu2 %v478_v40  ;;  %714 = vmatmul.f32.gmra.mxu3 %v626_v52 }
 0x1f0   :  { %v439_v53 = vpop.f32.mrf.mxu1  ;;  %v553_v54 = vpop.f32.mrf.mxu2 }
 0x1f1   :  { %v440_v55 = vadd.f32 %v1207_v58, %v439_v53  ;;  %v554_v56 = vadd.f32 %v1293_v49, %v553_v54 }
 0x1f3   :  { %v479_v57 = vmax.f32 %v440_v55, 0.0  ;;  %v627_v59 = vmax.f32 %v554_v56, 0.0 }
 0x1f5   :  { %603 = vmatmul.f32.gmra.mxu2 %v479_v57  ;;  %717 = vmatmul.f32.gmra.mxu3 %v627_v59 }
 0x1f8   :  { %v442_v60 = vpop.f32.mrf.mxu1  ;;  %v556_v61 = vpop.f32.mrf.mxu2 }
 0x1f9   :  { %v443_v62 = vadd.f32 %v1207_v58, %v442_v60  ;;  %v557_v63 = vadd.f32 %v1293_v49, %v556_v61 }
 0x1fb   :  { %v480_v0 = vmax.f32 %v443_v62, 0.0  ;;  %v628_v1 = vmax.f32 %v557_v63, 0.0 }
 0x1fd   :  { %606 = vmatmul.f32.gmra.mxu2 %v480_v0  ;;  %720 = vmatmul.f32.gmra.mxu3 %v628_v1 }
 0x200   :  { %v445_v2 = vpop.f32.mrf.mxu1  ;;  %v559_v3 = vpop.f32.mrf.mxu2 }
 0x201   :  { %v446_v4 = vadd.f32 %v1207_v58, %v445_v2  ;;  %v560_v5 = vadd.f32 %v1293_v49, %v559_v3 }
 0x203   :  { %v481_v6 = vmax.f32 %v446_v4, 0.0  ;;  %v629_v7 = vmax.f32 %v560_v5, 0.0 }
 0x205   :  { %609 = vmatmul.f32.gmra.mxu2 %v481_v6  ;;  %723 = vmatmul.f32.gmra.mxu3 %v629_v7 }
 0x208   :  { %v448_v8 = vpop.f32.mrf.mxu1  ;;  %v562_v9 = vpop.f32.mrf.mxu2 }
 0x209   :  { %v449_v10 = vadd.f32 %v1207_v58, %v448_v8  ;;  %v563_v11 = vadd.f32 %v1293_v49, %v562_v9  ;;  %v1330_v58 = vld [vmem:[%s1515_s8] ss:$0 sm:$0xff] }
 0x20b   :  { %v482_v12 = vmax.f32 %v449_v10, 0.0  ;;  %v630_v13 = vmax.f32 %v563_v11, 0.0 }
 0x20d   :  { %612 = vmatmul.f32.gmra.mxu2 %v482_v12  ;;  %726 = vmatmul.f32.gmra.mxu3 %v630_v13 }
 0x210   :  { %v565_v14 = vpop.f32.mrf.mxu2 }
 0x211   :  { %v566_v15 = vadd.f32 %v1293_v49, %v565_v14 }
 0x213   :  { %v631_v16 = vmax.f32 %v566_v15, 0.0 }
 0x215   :  { %729 = vmatmul.f32.gmra.mxu3 %v631_v16 }
 0x218   :  { %v568_v17 = vpop.f32.mrf.mxu2 }
 0x219   :  { %v569_v18 = vadd.f32 %v1293_v49, %v568_v17 }
 0x21b   :  { %v632_v19 = vmax.f32 %v569_v18, 0.0 }
 0x21d   :  { %732 = vmatmul.f32.gmra.mxu3 %v632_v19 }
 0x220   :  { %v571_v20 = vpop.f32.mrf.mxu2  ;;  %v685_v21 = vpop.f32.mrf.mxu3 }
 0x221   :  { %v572_v22 = vadd.f32 %v1293_v49, %v571_v20  ;;  %v686_v23 = vadd.f32 %v1330_v58, %v685_v21 }
 0x223   :  { %v633_v24 = vmax.f32 %v572_v22, 0.0  ;;  %v781_v25 = vmax.f32 %v686_v23, 0.0 }
 0x225   :  { %813 = vst.msk [vmem:[%s1516_s9] sm:$0xff] %vm76_vm0, %v781_v25  ;;  %735 = vmatmul.f32.gmra.mxu3 %v633_v24 }
 0x228   :  { %v574_v26 = vpop.f32.mrf.mxu2  ;;  %v688_v27 = vpop.f32.mrf.mxu3 }
 0x229   :  { %v575_v28 = vadd.f32 %v1293_v49, %v574_v26  ;;  %v689_v29 = vadd.f32 %v1330_v58, %v688_v27 }
 0x22b   :  { %v634_v30 = vmax.f32 %v575_v28, 0.0  ;;  %v782_v31 = vmax.f32 %v689_v29, 0.0 }
 0x22d   :  { %814 = vst.msk [vmem:[%s1516_s9 + $0x8] sm:$0xff] %vm76_vm0, %v782_v31  ;;  %738 = vmatmul.f32.gmra.mxu3 %v634_v30 }
 0x230   :  { %v577_v32 = vpop.f32.mrf.mxu2  ;;  %v691_v33 = vpop.f32.mrf.mxu3 }
 0x231   :  { %v578_v34 = vadd.f32 %v1293_v49, %v577_v32  ;;  %v692_v35 = vadd.f32 %v1330_v58, %v691_v33 }
 0x233   :  { %v635_v36 = vmax.f32 %v578_v34, 0.0  ;;  %v783_v37 = vmax.f32 %v692_v35, 0.0 }
 0x235   :  { %815 = vst.msk [vmem:[%s1516_s9 + $0x10] sm:$0xff] %vm76_vm0, %v783_v37  ;;  %741 = vmatmul.f32.gmra.mxu3 %v635_v36 }
 0x238   :  { %v580_v38 = vpop.f32.mrf.mxu2  ;;  %v694_v39 = vpop.f32.mrf.mxu3 }
 0x239   :  { %v581_v41 = vadd.f32 %v1293_v49, %v580_v38  ;;  %v695_v42 = vadd.f32 %v1330_v58, %v694_v39 }
 0x23b   :  { %v636_v43 = vmax.f32 %v581_v41, 0.0  ;;  %v784_v44 = vmax.f32 %v695_v42, 0.0 }
 0x23d   :  { %816 = vst.msk [vmem:[%s1516_s9 + $0x18] sm:$0xff] %vm76_vm0, %v784_v44  ;;  %744 = vmatmul.f32.gmra.mxu3 %v636_v43 }
 0x240   :  { %v583_v45 = vpop.f32.mrf.mxu2  ;;  %v697_v46 = vpop.f32.mrf.mxu3 }
 0x241   :  { %v584_v47 = vadd.f32 %v1293_v49, %v583_v45  ;;  %v698_v48 = vadd.f32 %v1330_v58, %v697_v46 }
 0x243   :  { %v637_v50 = vmax.f32 %v584_v47, 0.0  ;;  %v785_v51 = vmax.f32 %v698_v48, 0.0 }
 0x245   :  { %817 = vst.msk [vmem:[%s1516_s9 + $0x20] sm:$0xff] %vm76_vm0, %v785_v51  ;;  %747 = vmatmul.f32.gmra.mxu3 %v637_v50 }
 0x248   :  { %v586_v40 = vpop.f32.mrf.mxu2  ;;  %v700_v52 = vpop.f32.mrf.mxu3 }
 0x249   :  { %v587_v53 = vadd.f32 %v1293_v49, %v586_v40  ;;  %v701_v54 = vadd.f32 %v1330_v58, %v700_v52 }
 0x24b   :  { %v638_v55 = vmax.f32 %v587_v53, 0.0  ;;  %v786_v56 = vmax.f32 %v701_v54, 0.0 }
 0x24d   :  { %818 = vst.msk [vmem:[%s1516_s9 + $0x28] sm:$0xff] %vm76_vm0, %v786_v56  ;;  %750 = vmatmul.f32.gmra.mxu3 %v638_v55 }
 0x250   :  { %v589_v57 = vpop.f32.mrf.mxu2  ;;  %v703_v59 = vpop.f32.mrf.mxu3 }
 0x251   :  { %v590_v60 = vadd.f32 %v1293_v49, %v589_v57  ;;  %v704_v61 = vadd.f32 %v1330_v58, %v703_v59 }
 0x253   :  { %v639_v62 = vmax.f32 %v590_v60, 0.0  ;;  %v787_v63 = vmax.f32 %v704_v61, 0.0 }
 0x255   :  { %819 = vst.msk [vmem:[%s1516_s9 + $0x30] sm:$0xff] %vm76_vm0, %v787_v63  ;;  %753 = vmatmul.f32.gmra.mxu3 %v639_v62 }
 0x258   :  { %v592_v0 = vpop.f32.mrf.mxu2  ;;  %v706_v1 = vpop.f32.mrf.mxu3 }
 0x259   :  { %v593_v2 = vadd.f32 %v1293_v49, %v592_v0  ;;  %v707_v3 = vadd.f32 %v1330_v58, %v706_v1 }
 0x25b   :  { %v640_v4 = vmax.f32 %v593_v2, 0.0  ;;  %v788_v5 = vmax.f32 %v707_v3, 0.0 }
 0x25d   :  { %820 = vst.msk [vmem:[%s1516_s9 + $0x38] sm:$0xff] %vm76_vm0, %v788_v5  ;;  %756 = vmatmul.f32.gmra.mxu3 %v640_v4 }
 0x260   :  { %v595_v6 = vpop.f32.mrf.mxu2  ;;  %v709_v7 = vpop.f32.mrf.mxu3 }
 0x261   :  { %v596_v8 = vadd.f32 %v1293_v49, %v595_v6  ;;  %v710_v9 = vadd.f32 %v1330_v58, %v709_v7 }
 0x263   :  { %v641_v10 = vmax.f32 %v596_v8, 0.0  ;;  %v789_v11 = vmax.f32 %v710_v9, 0.0 }
 0x265   :  { %821 = vst.msk [vmem:[%s1516_s9 + $0x40] sm:$0xff] %vm76_vm0, %v789_v11  ;;  %759 = vmatmul.f32.gmra.mxu3 %v641_v10 }
 0x268   :  { %v598_v12 = vpop.f32.mrf.mxu2  ;;  %v712_v13 = vpop.f32.mrf.mxu3 }
 0x269   :  { %v599_v14 = vadd.f32 %v1293_v49, %v598_v12  ;;  %v713_v15 = vadd.f32 %v1330_v58, %v712_v13 }
 0x26b   :  { %v642_v16 = vmax.f32 %v599_v14, 0.0  ;;  %v790_v17 = vmax.f32 %v713_v15, 0.0 }
 0x26d   :  { %822 = vst.msk [vmem:[%s1516_s9 + $0x48] sm:$0xff] %vm76_vm0, %v790_v17  ;;  %762 = vmatmul.f32.gmra.mxu3 %v642_v16 }
 0x270   :  { %v601_v18 = vpop.f32.mrf.mxu2  ;;  %v715_v19 = vpop.f32.mrf.mxu3 }
 0x271   :  { %v602_v20 = vadd.f32 %v1293_v49, %v601_v18  ;;  %v716_v21 = vadd.f32 %v1330_v58, %v715_v19 }
 0x273   :  { %v643_v22 = vmax.f32 %v602_v20, 0.0  ;;  %v791_v23 = vmax.f32 %v716_v21, 0.0 }
 0x275   :  { %823 = vst.msk [vmem:[%s1516_s9 + $0x50] sm:$0xff] %vm76_vm0, %v791_v23  ;;  %765 = vmatmul.f32.gmra.mxu3 %v643_v22 }
 0x278   :  { %v604_v24 = vpop.f32.mrf.mxu2  ;;  %v718_v25 = vpop.f32.mrf.mxu3 }
 0x279   :  { %v605_v26 = vadd.f32 %v1293_v49, %v604_v24  ;;  %v719_v27 = vadd.f32 %v1330_v58, %v718_v25 }
 0x27b   :  { %v644_v28 = vmax.f32 %v605_v26, 0.0  ;;  %v792_v29 = vmax.f32 %v719_v27, 0.0 }
 0x27d   :  { %824 = vst.msk [vmem:[%s1516_s9 + $0x58] sm:$0xff] %vm76_vm0, %v792_v29  ;;  %768 = vmatmul.f32.gmra.mxu3 %v644_v28 }
 0x280   :  { %v607_v30 = vpop.f32.mrf.mxu2  ;;  %v721_v31 = vpop.f32.mrf.mxu3 }
 0x281   :  { %v608_v32 = vadd.f32 %v1293_v49, %v607_v30  ;;  %v722_v33 = vadd.f32 %v1330_v58, %v721_v31 }
 0x283   :  { %v645_v34 = vmax.f32 %v608_v32, 0.0  ;;  %v793_v35 = vmax.f32 %v722_v33, 0.0 }
 0x285   :  { %825 = vst.msk [vmem:[%s1516_s9 + $0x60] sm:$0xff] %vm76_vm0, %v793_v35  ;;  %771 = vmatmul.f32.gmra.mxu3 %v645_v34 }
 0x288   :  { %v610_v36 = vpop.f32.mrf.mxu2  ;;  %v724_v37 = vpop.f32.mrf.mxu3 }
 0x289   :  { %v611_v38 = vadd.f32 %v1293_v49, %v610_v36  ;;  %v725_v39 = vadd.f32 %v1330_v58, %v724_v37 }
 0x28b   :  { %v646_v41 = vmax.f32 %v611_v38, 0.0  ;;  %v794_v42 = vmax.f32 %v725_v39, 0.0 }
 0x28d   :  { %826 = vst.msk [vmem:[%s1516_s9 + $0x68] sm:$0xff] %vm76_vm0, %v794_v42  ;;  %774 = vmatmul.f32.gmra.mxu3 %v646_v41 }
 0x290   :  { %v613_v43 = vpop.f32.mrf.mxu2  ;;  %v727_v44 = vpop.f32.mrf.mxu3 }
 0x291   :  { %v614_v45 = vadd.f32 %v1293_v49, %v613_v43  ;;  %v728_v46 = vadd.f32 %v1330_v58, %v727_v44 }
 0x293   :  { %v647_v47 = vmax.f32 %v614_v45, 0.0  ;;  %v795_v48 = vmax.f32 %v728_v46, 0.0 }
 0x295   :  { %827 = vst.msk [vmem:[%s1516_s9 + $0x70] sm:$0xff] %vm76_vm0, %v795_v48  ;;  %777 = vmatmul.f32.gmra.mxu3 %v647_v47 }
 0x298   :  { %v730_v50 = vpop.f32.mrf.mxu3 }
 0x299   :  { %v731_v51 = vadd.f32 %v1330_v58, %v730_v50 }
 0x29b   :  { %v796_v40 = vmax.f32 %v731_v51, 0.0 }
 0x29d   :  { %828 = vst.msk [vmem:[%s1516_s9 + $0x78] sm:$0xff] %vm76_vm0, %v796_v40 }
 0x2a0   :  { %v733_v49 = vpop.f32.mrf.mxu3 }
 0x2a1   :  { %v734_v52 = vadd.f32 %v1330_v58, %v733_v49 }
 0x2a3   :  { %v797_v53 = vmax.f32 %v734_v52, 0.0 }
 0x2a5   :  { %829 = vst.msk [vmem:[%s1516_s9 + $0x80] sm:$0xff] %vm76_vm0, %v797_v53 }
 0x2a8   :  { %v736_v54 = vpop.f32.mrf.mxu3 }
 0x2a9   :  { %v737_v55 = vadd.f32 %v1330_v58, %v736_v54 }
 0x2ab   :  { %v798_v56 = vmax.f32 %v737_v55, 0.0 }
 0x2ad   :  { %830 = vst.msk [vmem:[%s1516_s9 + $0x88] sm:$0xff] %vm76_vm0, %v798_v56 }
 0x2b0   :  { %v739_v57 = vpop.f32.mrf.mxu3 }
 0x2b1   :  { %v740_v59 = vadd.f32 %v1330_v58, %v739_v57 }
 0x2b3   :  { %v799_v60 = vmax.f32 %v740_v59, 0.0 }
 0x2b5   :  { %831 = vst.msk [vmem:[%s1516_s9 + $0x90] sm:$0xff] %vm76_vm0, %v799_v60 }
 0x2b8   :  { %v742_v61 = vpop.f32.mrf.mxu3 }
 0x2b9   :  { %v743_v62 = vadd.f32 %v1330_v58, %v742_v61 }
 0x2bb   :  { %v800_v63 = vmax.f32 %v743_v62, 0.0 }
 0x2bd   :  { %832 = vst.msk [vmem:[%s1516_s9 + $0x98] sm:$0xff] %vm76_vm0, %v800_v63 }
 0x2c0   :  { %v745_v0 = vpop.f32.mrf.mxu3 }
 0x2c1   :  { %v746_v1 = vadd.f32 %v1330_v58, %v745_v0 }
 0x2c3   :  { %v801_v2 = vmax.f32 %v746_v1, 0.0 }
 0x2c5   :  { %833 = vst.msk [vmem:[%s1516_s9 + $0xa0] sm:$0xff] %vm76_vm0, %v801_v2 }
 0x2c8   :  { %v748_v3 = vpop.f32.mrf.mxu3 }
 0x2c9   :  { %v749_v4 = vadd.f32 %v1330_v58, %v748_v3 }
 0x2cb   :  { %v802_v5 = vmax.f32 %v749_v4, 0.0 }
 0x2cd   :  { %834 = vst.msk [vmem:[%s1516_s9 + $0xa8] sm:$0xff] %vm76_vm0, %v802_v5 }
 0x2d0   :  { %v751_v6 = vpop.f32.mrf.mxu3 }
 0x2d1   :  { %v752_v7 = vadd.f32 %v1330_v58, %v751_v6 }
 0x2d3   :  { %v803_v8 = vmax.f32 %v752_v7, 0.0 }
 0x2d5   :  { %835 = vst.msk [vmem:[%s1516_s9 + $0xb0] sm:$0xff] %vm76_vm0, %v803_v8 }
 0x2d8   :  { %v754_v9 = vpop.f32.mrf.mxu3 }
 0x2d9   :  { %v755_v10 = vadd.f32 %v1330_v58, %v754_v9 }
 0x2db   :  { %v804_v11 = vmax.f32 %v755_v10, 0.0 }
 0x2dd   :  { %836 = vst.msk [vmem:[%s1516_s9 + $0xb8] sm:$0xff] %vm76_vm0, %v804_v11 }
 0x2e0   :  { %v757_v12 = vpop.f32.mrf.mxu3 }
 0x2e1   :  { %v758_v13 = vadd.f32 %v1330_v58, %v757_v12 }
 0x2e3   :  { %v805_v14 = vmax.f32 %v758_v13, 0.0 }
 0x2e5   :  { %837 = vst.msk [vmem:[%s1516_s9 + $0xc0] sm:$0xff] %vm76_vm0, %v805_v14 }
 0x2e8   :  { %v760_v15 = vpop.f32.mrf.mxu3 }
 0x2e9   :  { %v761_v16 = vadd.f32 %v1330_v58, %v760_v15 }
 0x2eb   :  { %v806_v17 = vmax.f32 %v761_v16, 0.0 }
 0x2ed   :  { %838 = vst.msk [vmem:[%s1516_s9 + $0xc8] sm:$0xff] %vm76_vm0, %v806_v17 }
 0x2f0   :  { %v763_v18 = vpop.f32.mrf.mxu3 }
 0x2f1   :  { %v764_v19 = vadd.f32 %v1330_v58, %v763_v18 }
 0x2f3   :  { %v807_v20 = vmax.f32 %v764_v19, 0.0 }
 0x2f5   :  { %839 = vst.msk [vmem:[%s1516_s9 + $0xd0] sm:$0xff] %vm76_vm0, %v807_v20 }
 0x2f8   :  { %v766_v21 = vpop.f32.mrf.mxu3 }
 0x2f9   :  { %v767_v22 = vadd.f32 %v1330_v58, %v766_v21 }
 0x2fb   :  { %v808_v23 = vmax.f32 %v767_v22, 0.0 }
 0x2fd   :  { %840 = vst.msk [vmem:[%s1516_s9 + $0xd8] sm:$0xff] %vm76_vm0, %v808_v23 }
 0x300   :  { %v769_v24 = vpop.f32.mrf.mxu3 }
 0x301   :  { %v770_v25 = vadd.f32 %v1330_v58, %v769_v24 }
 0x303   :  { %v809_v26 = vmax.f32 %v770_v25, 0.0 }
 0x305   :  { %841 = vst.msk [vmem:[%s1516_s9 + $0xe0] sm:$0xff] %vm76_vm0, %v809_v26 }
 0x308   :  { %v772_v27 = vpop.f32.mrf.mxu3 }
 0x309   :  { %v773_v28 = vadd.f32 %v1330_v58, %v772_v27 }
 0x30b   :  { %v810_v29 = vmax.f32 %v773_v28, 0.0 }
 0x30d   :  { %842 = vst.msk [vmem:[%s1516_s9 + $0xe8] sm:$0xff] %vm76_vm0, %v810_v29 }
 0x310   :  { %v775_v30 = vpop.f32.mrf.mxu3 }
 0x311   :  { %v776_v31 = vadd.f32 %v1330_v58, %v775_v30 }
 0x313   :  { %v811_v32 = vmax.f32 %v776_v31, 0.0 }
 0x315   :  { %843 = vst.msk [vmem:[%s1516_s9 + $0xf0] sm:$0xff] %vm76_vm0, %v811_v32 }
 0x318   :  { %v778_v33 = vpop.f32.mrf.mxu3 }
 0x319   :  { %v779_v34 = vadd.f32 %v1330_v58, %v778_v33 }
 0x31b   :  { %v812_v35 = vmax.f32 %v779_v34, 0.0 }
 0x31d   :  { %844 = vst.msk [vmem:[%s1516_s9 + $0xf8] sm:$0xff] %vm76_vm0, %v812_v35 }

</bundles_post_ra>
